<compile_context>
chip_gen: v6e
topology: v6e:2x2x1
jax: 0.10.0
libtpu: 0.0.40
codegen_flags: <defaults>
</compile_context>

<pallas_src>
import jax
import jax.numpy as jnp
from jax.experimental import pallas as pl
from jax.experimental.pallas import tpu as pltpu


def _round_up(x, m):
    return ((x + m - 1) // m) * m


def _pick_block(n):
    """Block size for padding/tiling the adjacency (multiple of 128)."""
    n128 = _round_up(max(n, 1), 128)
    if n128 <= 1024:
        return 128
    if n128 <= 4096:
        return 256
    return 512


def _physical_vmem_bytes():
    try:
        return int(pltpu.get_tpu_info().vmem_capacity_bytes)
    except Exception:
        return 64 * 1024 * 1024          # conservative (v7x) fallback


def _compiler_params(est_vmem_bytes):
    # Ask for what we estimate (x2 safety), never more than ~75% of physical
    # VMEM (leaves headroom for Mosaic internal scratch; 48 MiB on v7x,
    # 96 MiB on v5e/v6e).
    cap = (_physical_vmem_bytes() * 3) // 4
    vmem = int(min(max(2 * est_vmem_bytes, 16 * 1024 * 1024), cap))
    return pltpu.CompilerParams(
        dimension_semantics=("parallel", "arbitrary"),   # rows || , K-reduction seq
        vmem_limit_bytes=vmem,
    )


def _tiles_for(n_pad):
    """(tm, tk) such that both divide n_pad, are multiples of 128, and the row
    axis keeps >= 2 blocks for megacore sharding when possible."""
    blk = max(b for b in (512, 256, 128) if n_pad % b == 0)
    tk = blk
    tm = blk
    while tm > 128 and n_pad // tm < 2:
        tm //= 2
    return tm, tk


# ---------------------------------------------------------------------------
# Kernel 1: H = relu(A_hat @ XW1 + b1)            (GCNConv 1 + ReLU)
#   grid = (rows, cols); adj block (tm, tk); f32 accumulator scratch.
# ---------------------------------------------------------------------------
def _conv1_kernel(adj_ref, xw_ref, b1_ref, h_ref, acc_ref):
    @pl.when(pl.program_id(1) == 0)
    def _():
        acc_ref[...] = jnp.zeros_like(acc_ref)

    acc_ref[...] += jnp.dot(adj_ref[...], xw_ref[...],
                            preferred_element_type=jnp.float32)

    @pl.when(pl.program_id(1) == pl.num_programs(1) - 1)
    def _():
        h = jnp.maximum(acc_ref[...] + b1_ref[...], 0.0)   # bias + ReLU in f32
        # F.dropout(training=False) -> identity
        h_ref[...] = h.astype(h_ref.dtype)                 # bf16 feed for layer 2


# ---------------------------------------------------------------------------
# Kernel 2: H2 = A_hat @ HW2 + b2                 (GCNConv 2)
#           logits = H2 @ W3 + b3 ; log_softmax(dim=1)
#           out slab = [log_probs | embedding | 0-pad]  (lane-dense, 128-wide)
# ---------------------------------------------------------------------------
def _conv2_head_kernel(adj_ref, hw_ref, b2_ref, w3_ref, b3_ref, out_ref, acc_ref):
    @pl.when(pl.program_id(1) == 0)
    def _():
        acc_ref[...] = jnp.zeros_like(acc_ref)

    acc_ref[...] += jnp.dot(adj_ref[...], hw_ref[...],
                            preferred_element_type=jnp.float32)

    @pl.when(pl.program_id(1) == pl.num_programs(1) - 1)
    def _():
        h2 = acc_ref[...] + b2_ref[...]                    # embedding (f32)
        # F.dropout(training=False) -> identity
        logits = jnp.dot(h2, w3_ref[...],
                         preferred_element_type=jnp.float32) + b3_ref[...]
        m = jnp.max(logits, axis=1, keepdims=True)
        s = logits - m
        lse = jnp.log(jnp.sum(jnp.exp(s), axis=1, keepdims=True))
        logp = s - lse

        out_dim = logits.shape[1]
        emb_dim = h2.shape[1]
        pad = out_ref.shape[1] - out_dim - emb_dim
        pieces = [logp, h2]
        if pad > 0:
            pieces.append(jnp.zeros((logp.shape[0], pad), jnp.float32))
        out_ref[...] = jnp.concatenate(pieces, axis=1)     # one dense (tm,128) store


# ---------------------------------------------------------------------------
# Adjacency construction / one-time preparation
# ---------------------------------------------------------------------------
def build_normalized_adjacency(edge_index, num_nodes):
    """A_hat = D^-1/2 (A + I) D^-1/2, dense f32, from a (2, E) edge_index."""
    src, dst = edge_index[0], edge_index[1]
    a = jnp.zeros((num_nodes, num_nodes), jnp.float32)
    # torch_geometric aggregates source -> target (row = target); duplicate
    # edges scatter-ADD, matching gcn_norm's edge-weight accumulation.
    a = a.at[dst, src].add(1.0)
    a = a + jnp.eye(num_nodes, dtype=jnp.float32)          # self loops
    deg = jnp.sum(a, axis=1)
    d_inv_sqrt = jnp.where(deg > 0, 1.0 / jnp.sqrt(deg), 0.0)
    return d_inv_sqrt[:, None] * a * d_inv_sqrt[None, :]


def prepare_adjacency(adj):
    """Pad to a tileable size and cast to the MXU feed dtype ONCE.

    Call this once per graph and reuse the result across forward calls; doing
    the cast/pad per call roughly doubles the HBM traffic of the whole model.
    """
    n = adj.shape[0]
    n_pad = _round_up(n, _pick_block(n))
    return jnp.pad(adj.astype(jnp.bfloat16), ((0, n_pad - n), (0, n_pad - n)))


# ---------------------------------------------------------------------------
# Forward wrapper
# ---------------------------------------------------------------------------
def gcn_net1_forward(adj16, x, w1, b1, w2, b2, w3, b3):
    """adj16: pre-padded bf16 A_hat from prepare_adjacency(); x: (N, F) f32."""
    n, f_in = x.shape
    n_pad = adj16.shape[0]
    hid = w1.shape[1]
    emb = w2.shape[1]
    out = w3.shape[1]

    tm, tk = _tiles_for(n_pad)
    pack = _round_up(out + emb, 128)          # lane-dense packed output width
    grid = (n_pad // tm, n_pad // tk)

    b1f = b1.reshape(1, hid).astype(jnp.float32)
    b2f = b2.reshape(1, emb).astype(jnp.float32)
    w3f = w3.astype(jnp.float32)
    b3f = b3.reshape(1, out).astype(jnp.float32)

    # Precompute XW1 once (tiny O(N*F*hid) XLA matmul); padded rows are zero.
    x_pad = jnp.pad(x.astype(jnp.float32), ((0, n_pad - n), (0, 0)))
    xw1 = jnp.dot(x_pad, w1.astype(jnp.float32),
                  preferred_element_type=jnp.float32).astype(jnp.bfloat16)

    # ---- GCNConv 1 + ReLU ----
    conv1_vmem = (2 * tm * tk * 2 + 2 * tk * hid * 2 + hid * 4
                  + tm * hid * 4 + 2 * tm * hid * 2)
    h = pl.pallas_call(
        _conv1_kernel,
        out_shape=jax.ShapeDtypeStruct((n_pad, hid), jnp.bfloat16),
        grid=grid,
        in_specs=[
            pl.BlockSpec((tm, tk), lambda i, k: (i, k)),     # adj tile
            pl.BlockSpec((tk, hid), lambda i, k: (k, 0)),    # XW1 k-slice
            pl.BlockSpec((1, hid), lambda i, k: (0, 0)),     # b1
        ],
        out_specs=pl.BlockSpec((tm, hid), lambda i, k: (i, 0)),
        scratch_shapes=[pltpu.VMEM((tm, hid), jnp.float32)],
        compiler_params=_compiler_params(conv1_vmem),
        cost_estimate=pl.CostEstimate(
            flops=2 * n_pad * n_pad * hid,
            transcendentals=0,
            bytes_accessed=n_pad * n_pad * 2 + 2 * n_pad * hid * 2 + hid * 4),
    )(adj16, xw1, b1f)

    # Precompute HW2 once (tiny O(N*hid*emb) XLA matmul).
    hw2 = jnp.dot(h, w2.astype(jnp.bfloat16),
                  preferred_element_type=jnp.float32).astype(jnp.bfloat16)

    # ---- GCNConv 2 + Linear + log_softmax (packed lane-dense output) ----
    conv2_vmem = (2 * tm * tk * 2 + 2 * tk * emb * 2 + (emb + out) * 4
                  + emb * out * 4 + tm * emb * 4 + 2 * tm * pack * 4)
    packed = pl.pallas_call(
        _conv2_head_kernel,
        out_shape=jax.ShapeDtypeStruct((n_pad, pack), jnp.float32),
        grid=grid,
        in_specs=[
            pl.BlockSpec((tm, tk), lambda i, k: (i, k)),     # adj tile
            pl.BlockSpec((tk, emb), lambda i, k: (k, 0)),    # HW2 k-slice
            pl.BlockSpec((1, emb), lambda i, k: (0, 0)),     # b2
            pl.BlockSpec((emb, out), lambda i, k: (0, 0)),   # W3
            pl.BlockSpec((1, out), lambda i, k: (0, 0)),     # b3
        ],
        out_specs=pl.BlockSpec((tm, pack), lambda i, k: (i, 0)),
        scratch_shapes=[pltpu.VMEM((tm, emb), jnp.float32)],
        compiler_params=_compiler_params(conv2_vmem),
        cost_estimate=pl.CostEstimate(
            flops=2 * n_pad * n_pad * emb + 2 * n_pad * emb * out,
            transcendentals=n_pad * (out + 1),
            bytes_accessed=n_pad * n_pad * 2 + n_pad * emb * 2
                           + n_pad * pack * 4 + (emb + 1) * (out + 1) * 4),
    )(adj16, hw2, b2f, w3f, b3f)

    logp = packed[:n, :out]
    embedding = packed[:n, out:out + emb]
    return logp, embedding


if __name__ == "__main__":
    key = jax.random.PRNGKey(0)

    # Small-but-tileable shapes implied by the module.
    N = 256                # number of nodes
    F_IN = 16              # dataset.num_node_features
    HID = 32               # hidden_num
    EMB = 16               # embedding_num
    OUT = 8                # out_num
    E = 1024               # number of edges

    k_x, k_e1, k_e2, k_w1, k_b1, k_w2, k_b2, k_w3, k_b3 = jax.random.split(key, 9)

    x = jax.random.normal(k_x, (N, F_IN), jnp.float32)
    edge_index = jnp.stack([
        jax.random.randint(k_e1, (E,), 0, N),
        jax.random.randint(k_e2, (E,), 0, N),
    ])

    adj = build_normalized_adjacency(edge_index, N)   # dense f32 A_hat
    adj16 = prepare_adjacency(adj)                    # padded bf16, built ONCE
    jax.block_until_ready(adj16)

    w1 = jax.random.normal(k_w1, (F_IN, HID), jnp.float32) * (1.0 / jnp.sqrt(F_IN))
    b1 = jax.random.normal(k_b1, (HID,), jnp.float32) * 0.01
    w2 = jax.random.normal(k_w2, (HID, EMB), jnp.float32) * (1.0 / jnp.sqrt(HID))
    b2 = jax.random.normal(k_b2, (EMB,), jnp.float32) * 0.01
    w3 = jax.random.normal(k_w3, (EMB, OUT), jnp.float32) * (1.0 / jnp.sqrt(EMB))
    b3 = jax.random.normal(k_b3, (OUT,), jnp.float32) * 0.01

    fwd = jax.jit(gcn_net1_forward)
    logp, embedding = fwd(adj16, x, w1, b1, w2, b2, w3, b3)
    jax.block_until_ready((logp, embedding))

    # Pure-JAX f32 reference (forward-pass semantics of the PyTorch module,
    # eval mode: dropout = identity).
    h_ref = jnp.maximum(adj @ (x @ w1) + b1[None, :], 0.0)
    h2_ref = adj @ (h_ref @ w2) + b2[None, :]
    logits_ref = h2_ref @ w3 + b3[None, :]
    logp_ref = jax.nn.log_softmax(logits_ref, axis=1)

    assert logp.shape == (N, OUT) and embedding.shape == (N, EMB)
    assert jnp.allclose(jnp.sum(jnp.exp(logp), axis=1), 1.0, atol=1e-4)
    assert jnp.allclose(embedding, h2_ref, atol=7e-2, rtol=7e-2)
    assert jnp.allclose(logp, logp_ref, atol=7e-2, rtol=7e-2)

    print("KERNEL_OK")
</pallas_src>

<mosaic_0001>
module attributes {stable_mosaic.version = 11 : i64} {
  func.func @_conv1_kernel(%arg0: i32, %arg1: i32, %arg2: memref<128x256xbf16, #tpu.memory_space<vmem>>, %arg3: memref<256x32xbf16, #tpu.memory_space<vmem>>, %arg4: memref<1x32xf32, #tpu.memory_space<vmem>>, %arg5: memref<128x32xbf16, #tpu.memory_space<vmem>>, %arg6: memref<128x32xf32, #tpu.memory_space<vmem>>) attributes {dimension_semantics = [#tpu.dimension_semantics<parallel>, #tpu.dimension_semantics<arbitrary>], iteration_bounds = array<i64: 2, 1>, scalar_prefetch = 0 : i64, scratch_operands = 1 : i64, tpu.core_type = #tpu.core_type<tc>, window_params = [{transform_indices = @transform_0, window_bounds = array<i64: 128, 256>}, {transform_indices = @transform_1, window_bounds = array<i64: 256, 32>}, {pipeline_mode = #tpu.pipeline_mode<synchronous>, transform_indices = @transform_2, window_bounds = array<i64: 1, 32>}, {transform_indices = @transform_3, window_bounds = array<i64: 128, 32>}]} {
    %c0_i32 = arith.constant 0 : i32
    %0 = arith.cmpi eq, %arg1, %c0_i32 : i32
    %1 = arith.extui %0 : i1 to i32
    %c0_i32_0 = arith.constant 0 : i32
    %2 = arith.cmpi ne, %1, %c0_i32_0 : i32
    scf.if %2 {
      %cst_10 = arith.constant 0.000000e+00 : f32
      %12 = vector.broadcast %cst_10 : f32 to vector<128x32xf32>
      %c0_11 = arith.constant 0 : index
      %c0_12 = arith.constant 0 : index
      %13 = vector.load %arg6[%c0_11, %c0_12] : memref<128x32xf32, #tpu.memory_space<vmem>>, vector<128x32xf32>
      tpu.vector_store %arg6[%c0_11, %c0_12], %12 {strides = array<i32>} : memref<128x32xf32, #tpu.memory_space<vmem>>, vector<128x32xf32>,
    } else {
    }
    %c0 = arith.constant 0 : index
    %c0_1 = arith.constant 0 : index
    %3 = vector.load %arg6[%c0, %c0_1] : memref<128x32xf32, #tpu.memory_space<vmem>>, vector<128x32xf32>
    %c0_2 = arith.constant 0 : index
    %c0_3 = arith.constant 0 : index
    %4 = vector.load %arg2[%c0_2, %c0_3] : memref<128x256xbf16, #tpu.memory_space<vmem>>, vector<128x256xbf16>
    %c0_4 = arith.constant 0 : index
    %c0_5 = arith.constant 0 : index
    %5 = vector.load %arg3[%c0_4, %c0_5] : memref<256x32xbf16, #tpu.memory_space<vmem>>, vector<256x32xbf16>
    %cst = arith.constant dense<0.000000e+00> : vector<128x32xf32>
    %6 = tpu.matmul %4, %5, %cst {dimension_numbers = #tpu.dot_dimension_numbers<[1], [0], [0], [1], [0, 0, 1, 1], [], []>} : vector<128x256xbf16>, vector<256x32xbf16>, vector<128x32xf32> -> vector<128x32xf32>
    %7 = arith.addf %3, %6 : vector<128x32xf32>
    %c0_6 = arith.constant 0 : index
    %c0_7 = arith.constant 0 : index
    %8 = vector.load %arg6[%c0_6, %c0_7] : memref<128x32xf32, #tpu.memory_space<vmem>>, vector<128x32xf32>
    tpu.vector_store %arg6[%c0_6, %c0_7], %7 {strides = array<i32>} : memref<128x32xf32, #tpu.memory_space<vmem>>, vector<128x32xf32>,
    %c0_i32_8 = arith.constant 0 : i32
    %9 = arith.cmpi eq, %arg1, %c0_i32_8 : i32
    %10 = arith.extui %9 : i1 to i32
    %c0_i32_9 = arith.constant 0 : i32
    %11 = arith.cmpi ne, %10, %c0_i32_9 : i32
    scf.if %11 {
      %c0_10 = arith.constant 0 : index
      %c0_11 = arith.constant 0 : index
      %12 = vector.load %arg6[%c0_10, %c0_11] : memref<128x32xf32, #tpu.memory_space<vmem>>, vector<128x32xf32>
      %c0_12 = arith.constant 0 : index
      %c0_13 = arith.constant 0 : index
      %13 = vector.load %arg4[%c0_12, %c0_13] : memref<1x32xf32, #tpu.memory_space<vmem>>, vector<1x32xf32>
      %14 = vector.broadcast %13 : vector<1x32xf32> to vector<128x32xf32>
      %15 = arith.addf %12, %14 : vector<128x32xf32>
      %cst_14 = arith.constant 0.000000e+00 : f32
      %16 = vector.broadcast %cst_14 : f32 to vector<128x32xf32>
      %17 = arith.maximumf %15, %16 : vector<128x32xf32>
      %18 = arith.truncf %17 : vector<128x32xf32> to vector<128x32xbf16>
      %c0_15 = arith.constant 0 : index
      %c0_16 = arith.constant 0 : index
      %19 = vector.load %arg5[%c0_15, %c0_16] : memref<128x32xbf16, #tpu.memory_space<vmem>>, vector<128x32xbf16>
      tpu.vector_store %arg5[%c0_15, %c0_16], %18 {strides = array<i32>} : memref<128x32xbf16, #tpu.memory_space<vmem>>, vector<128x32xbf16>,
    } else {
    }
    return
  }
  func.func @transform_0(%arg0: i32, %arg1: i32) -> (i32, i32) {
    %c0_i32 = arith.constant 0 : i32
    return %arg0, %arg1 : i32, i32
  }
  func.func @transform_1(%arg0: i32, %arg1: i32) -> (i32, i32) {
    %c0_i32 = arith.constant 0 : i32
    %c0_i32_0 = arith.constant 0 : i32
    return %arg1, %c0_i32 : i32, i32
  }
  func.func @transform_2(%arg0: i32, %arg1: i32) -> (i32, i32) {
    %c0_i32 = arith.constant 0 : i32
    %c0_i32_0 = arith.constant 0 : i32
    %c0_i32_1 = arith.constant 0 : i32
    return %c0_i32, %c0_i32_0 : i32, i32
  }
  func.func @transform_3(%arg0: i32, %arg1: i32) -> (i32, i32) {
    %c0_i32 = arith.constant 0 : i32
    %c0_i32_0 = arith.constant 0 : i32
    return %arg0, %c0_i32 : i32, i32
  }
}

module attributes {stable_mosaic.version = 11 : i64} {
  func.func @_conv2_head_kernel(%arg0: i32, %arg1: i32, %arg2: memref<128x256xbf16, #tpu.memory_space<vmem>>, %arg3: memref<256x16xbf16, #tpu.memory_space<vmem>>, %arg4: memref<1x16xf32, #tpu.memory_space<vmem>>, %arg5: memref<16x8xf32, #tpu.memory_space<vmem>>, %arg6: memref<1x8xf32, #tpu.memory_space<vmem>>, %arg7: memref<128x128xf32, #tpu.memory_space<vmem>>, %arg8: memref<128x16xf32, #tpu.memory_space<vmem>>) attributes {dimension_semantics = [#tpu.dimension_semantics<parallel>, #tpu.dimension_semantics<arbitrary>], iteration_bounds = array<i64: 2, 1>, scalar_prefetch = 0 : i64, scratch_operands = 1 : i64, tpu.core_type = #tpu.core_type<tc>, window_params = [{transform_indices = @transform_0, window_bounds = array<i64: 128, 256>}, {transform_indices = @transform_1, window_bounds = array<i64: 256, 16>}, {pipeline_mode = #tpu.pipeline_mode<synchronous>, transform_indices = @transform_2, window_bounds = array<i64: 1, 16>}, {pipeline_mode = #tpu.pipeline_mode<synchronous>, transform_indices = @transform_3, window_bounds = array<i64: 16, 8>}, {pipeline_mode = #tpu.pipeline_mode<synchronous>, transform_indices = @transform_4, window_bounds = array<i64: 1, 8>}, {transform_indices = @transform_5, window_bounds = array<i64: 128, 128>}]} {
    %c0_i32 = arith.constant 0 : i32
    %0 = arith.cmpi eq, %arg1, %c0_i32 : i32
    %1 = arith.extui %0 : i1 to i32
    %c0_i32_0 = arith.constant 0 : i32
    %2 = arith.cmpi ne, %1, %c0_i32_0 : i32
    scf.if %2 {
      %cst_10 = arith.constant 0.000000e+00 : f32
      %12 = vector.broadcast %cst_10 : f32 to vector<128x16xf32>
      %c0_11 = arith.constant 0 : index
      %c0_12 = arith.constant 0 : index
      %13 = vector.load %arg8[%c0_11, %c0_12] : memref<128x16xf32, #tpu.memory_space<vmem>>, vector<128x16xf32>
      tpu.vector_store %arg8[%c0_11, %c0_12], %12 {strides = array<i32>} : memref<128x16xf32, #tpu.memory_space<vmem>>, vector<128x16xf32>,
    } else {
    }
    %c0 = arith.constant 0 : index
    %c0_1 = arith.constant 0 : index
    %3 = vector.load %arg8[%c0, %c0_1] : memref<128x16xf32, #tpu.memory_space<vmem>>, vector<128x16xf32>
    %c0_2 = arith.constant 0 : index
    %c0_3 = arith.constant 0 : index
    %4 = vector.load %arg2[%c0_2, %c0_3] : memref<128x256xbf16, #tpu.memory_space<vmem>>, vector<128x256xbf16>
    %c0_4 = arith.constant 0 : index
    %c0_5 = arith.constant 0 : index
    %5 = vector.load %arg3[%c0_4, %c0_5] : memref<256x16xbf16, #tpu.memory_space<vmem>>, vector<256x16xbf16>
    %cst = arith.constant dense<0.000000e+00> : vector<128x16xf32>
    %6 = tpu.matmul %4, %5, %cst {dimension_numbers = #tpu.dot_dimension_numbers<[1], [0], [0], [1], [0, 0, 1, 1], [], []>} : vector<128x256xbf16>, vector<256x16xbf16>, vector<128x16xf32> -> vector<128x16xf32>
    %7 = arith.addf %3, %6 : vector<128x16xf32>
    %c0_6 = arith.constant 0 : index
    %c0_7 = arith.constant 0 : index
    %8 = vector.load %arg8[%c0_6, %c0_7] : memref<128x16xf32, #tpu.memory_space<vmem>>, vector<128x16xf32>
    tpu.vector_store %arg8[%c0_6, %c0_7], %7 {strides = array<i32>} : memref<128x16xf32, #tpu.memory_space<vmem>>, vector<128x16xf32>,
    %c0_i32_8 = arith.constant 0 : i32
    %9 = arith.cmpi eq, %arg1, %c0_i32_8 : i32
    %10 = arith.extui %9 : i1 to i32
    %c0_i32_9 = arith.constant 0 : i32
    %11 = arith.cmpi ne, %10, %c0_i32_9 : i32
    scf.if %11 {
      %c0_10 = arith.constant 0 : index
      %c0_11 = arith.constant 0 : index
      %12 = vector.load %arg8[%c0_10, %c0_11] : memref<128x16xf32, #tpu.memory_space<vmem>>, vector<128x16xf32>
      %c0_12 = arith.constant 0 : index
      %c0_13 = arith.constant 0 : index
      %13 = vector.load %arg4[%c0_12, %c0_13] : memref<1x16xf32, #tpu.memory_space<vmem>>, vector<1x16xf32>
      %14 = vector.broadcast %13 : vector<1x16xf32> to vector<128x16xf32>
      %15 = arith.addf %12, %14 : vector<128x16xf32>
      %c0_14 = arith.constant 0 : index
      %c0_15 = arith.constant 0 : index
      %16 = vector.load %arg5[%c0_14, %c0_15] : memref<16x8xf32, #tpu.memory_space<vmem>>, vector<16x8xf32>
      %cst_16 = arith.constant dense<0.000000e+00> : vector<128x8xf32>
      %17 = tpu.matmul %15, %16, %cst_16 {dimension_numbers = #tpu.dot_dimension_numbers<[1], [0], [0], [1], [0, 0, 1, 1], [], []>} : vector<128x16xf32>, vector<16x8xf32>, vector<128x8xf32> -> vector<128x8xf32>
      %c0_17 = arith.constant 0 : index
      %c0_18 = arith.constant 0 : index
      %18 = vector.load %arg6[%c0_17, %c0_18] : memref<1x8xf32, #tpu.memory_space<vmem>>, vector<1x8xf32>
      %19 = vector.broadcast %18 : vector<1x8xf32> to vector<128x8xf32>
      %20 = arith.addf %17, %19 : vector<128x8xf32>
      %cst_19 = arith.constant dense<0xFF800000> : vector<128xf32>
      %21 = vector.multi_reduction <maximumf>, %20, %cst_19 [1] : vector<128x8xf32> to vector<128xf32>
      %22 = vector.shape_cast %21 : vector<128xf32> to vector<128x1xf32>
      %23 = vector.broadcast %22 : vector<128x1xf32> to vector<128x8xf32>
      %24 = arith.subf %20, %23 : vector<128x8xf32>
      %25 = math.exp %24 : vector<128x8xf32>
      %cst_20 = arith.constant dense<0.000000e+00> : vector<128xf32>
      %26 = vector.multi_reduction <add>, %25, %cst_20 [1] : vector<128x8xf32> to vector<128xf32>
      %27 = vector.shape_cast %26 : vector<128xf32> to vector<128x1xf32>
      %28 = math.log %27 : vector<128x1xf32>
      %29 = vector.broadcast %28 : vector<128x1xf32> to vector<128x8xf32>
      %30 = arith.subf %24, %29 : vector<128x8xf32>
      %cst_21 = arith.constant 0.000000e+00 : f32
      %31 = vector.broadcast %cst_21 : f32 to vector<128x104xf32>
      %32 = tpu.concatenate %30, %15, %31 in 1 : vector<128x8xf32>, vector<128x16xf32>, vector<128x104xf32> -> vector<128x128xf32>
      %c0_22 = arith.constant 0 : index
      %c0_23 = arith.constant 0 : index
      %33 = vector.load %arg7[%c0_22, %c0_23] : memref<128x128xf32, #tpu.memory_space<vmem>>, vector<128x128xf32>
      tpu.vector_store %arg7[%c0_22, %c0_23], %32 {strides = array<i32>} : memref<128x128xf32, #tpu.memory_space<vmem>>, vector<128x128xf32>,
    } else {
    }
    return
  }
  func.func @transform_0(%arg0: i32, %arg1: i32) -> (i32, i32) {
    %c0_i32 = arith.constant 0 : i32
    return %arg0, %arg1 : i32, i32
  }
  func.func @transform_1(%arg0: i32, %arg1: i32) -> (i32, i32) {
    %c0_i32 = arith.constant 0 : i32
    %c0_i32_0 = arith.constant 0 : i32
    return %arg1, %c0_i32 : i32, i32
  }
  func.func @transform_2(%arg0: i32, %arg1: i32) -> (i32, i32) {
    %c0_i32 = arith.constant 0 : i32
    %c0_i32_0 = arith.constant 0 : i32
    %c0_i32_1 = arith.constant 0 : i32
    return %c0_i32, %c0_i32_0 : i32, i32
  }
  func.func @transform_3(%arg0: i32, %arg1: i32) -> (i32, i32) {
    %c0_i32 = arith.constant 0 : i32
    %c0_i32_0 = arith.constant 0 : i32
    %c0_i32_1 = arith.constant 0 : i32
    return %c0_i32, %c0_i32_0 : i32, i32
  }
  func.func @transform_4(%arg0: i32, %arg1: i32) -> (i32, i32) {
    %c0_i32 = arith.constant 0 : i32
    %c0_i32_0 = arith.constant 0 : i32
    %c0_i32_1 = arith.constant 0 : i32
    return %c0_i32, %c0_i32_0 : i32, i32
  }
  func.func @transform_5(%arg0: i32, %arg1: i32) -> (i32, i32) {
    %c0_i32 = arith.constant 0 : i32
    %c0_i32_0 = arith.constant 0 : i32
    return %arg0, %c0_i32 : i32, i32
  }
}

</mosaic_0001>

<bundles_post_ra>
// kernel: gcn_net1_forward.2
= control target key start
LH: loop header
LB: loop body
LE: loop exit
PB: predicated region body
PF: predicated region fallthrough
CT: control target
= control target key end

     0   :  { %8 = vsyncpa [#allocation4], 0  ;;  %s1473_s0 = inlined_call_operand.hbm [shape: bf16[256,256], index: 0, kind: input, shape index: {}]   ;;  %s1474_s1 = inlined_call_operand.vmem [shape: bf16[256,32], index: 1, kind: input, shape index: {}]   ;;  %s1475_s2 = inlined_call_operand.vmem [shape: f32[1,32], index: 2, kind: input, shape index: {}]   ;;  %s1476_s3 = inlined_call_operand.vmem [shape: bf16[256,32], index: 3, kind: output, shape index: {}]  }
   0x1   :  { %10 = vsyncpa [#allocation4 + $0x1], 0  ;;  %s1222_s12 = smov 0   ;;  %s1224_s13 = smov 0  }
   0x2   :  { %s1226_s14 = smov 0   ;;  %s1228_s15 = smov 0  }
   0x3   :  { %s1230_s16 = smov 0   ;;  %s1232_s17 = smov 0  }
   0x4 LB: > { %s858_s18 = sadd.s32 4294967295, %s1196_s17   ;;  %s28_s19 = sadd.s32 1, %s1192_s16  ;;  %s1196_s17 = sphi %s1232_s17, %s16_s17   ;;  %s1192_s16 = sphi %s1230_s16, %s1484_s16   ;;  %s1188_s15 = sphi %s1228_s15, %s1483_s15   ;;  %s1184_s14 = sphi %s1226_s14, %s1482_s14   ;;  %s1180_s13 = sphi %s1224_s13, %s1481_s13   ;;  %s1176_s12 = sphi %s1222_s12, %s1480_s12  }
   0x5   : > { %p30_p0 = scmp.ge.s32.totalorder %s28_s19, 2  ;;  %s37_s20 = sadd.s32 1, %s1184_s14 }
   0x6   : > { %p44_p1 = scmp.ne.s32.totalorder %s1184_s14, %s1180_s13  ;;  %p45_p2 = scmp.eq.s32.totalorder %s1196_s17, 0 }
   0x7   : > { %s1486_s19 = smov (%p30_p0, %s28_s19), 0  ;;  %p50_p4 = scmp.ne.s32.totalorder %s1180_s13, %s1176_s12 }
   0x8   : > { %p1258_p3 = por %p45_p2, %p44_p1  ;;  %s32_s22 = ssub.s32 %s1192_s16, %s1486_s19 }
   0x9   : > { %p51_p5 = scmp.eq.s32.totalorder %s858_s18, 0  ;;  %p35_p6 = scmp.eq.s32.totalorder %s32_s22, 0 }
   0xa   : > { %p1026_p8 = scmp.lt.s32.totalorder %s1196_s17, 2  ;;  %s159_s25 = sand.u32 1, %s1184_s14  }
   0xb   : > { %p1265_p7 = por %p51_p5, %p50_p4  ;;  %s923_s26 = sshll.u32 %s1192_s16, 11 }
   0xc   : > { %s1271_s24 = scalar_select %p35_p6, %s1184_s14, %s37_s20  }
   0xd   : > { %s863_s27 = sshll.u32 %s159_s25, 7  ;;  %s172_s30 = scalar_lea.hbm %s1473_s0, %s923_s26 }
   0xe   : > { %s163_s4 = scalar_lea.vmem [#allocation3], %s863_s27  ;;  %p1280_p9 = pnand %p1026_p8, %p1258_p3 }
   0xf   : > { %s173_s5 = sshll.u32 %s163_s4, 4  ;;  %s160_s7 = scalar_lea.sflag [#allocation4], %s159_s25  ;;  %s174_s5 = int_to_ptr.vmem [resolvable:$true] %s173_s5 }
  0x10   : > { %p1120_p10 = pneg %p1280_p9  ;;  %s1131_s8 = scalar_lea.vmem %s174_s5, 2048 }
  0x11   : > { %p1132_p11 = scmp.ne.s32.totalorder %s174_s5, %s1131_s8  ;;  %s1198_s9 = smov [#allocation3]  }
  0x12   : > { %s1136_s10 = sshll.u32 %s1198_s9, 4  ;;  %s1137_s10 = int_to_ptr.vmem [resolvable:$false] %s1136_s10 }
  0x13   : > { %p1134_p12 = pnand %p1132_p11, %p1120_p10  ;;  %s1138_s11 = scalar_lea.vmem %s1137_s10, 4096 }
  0x14   : > { %p1139_p0 = scmp.lt.s32.totalorder %s174_s5, %s1137_s10  ;;  %p1140_p1 = scmp.lt.s32.totalorder %s1138_s11, %s1131_s8 }
  0x15   : > { %p1135_p13 = pneg %p1134_p12 }
  0x16   : > { %p1141_p2 = por %p1140_p1, %p1139_p0 }
  0x18   : > { %p1142_p3 = pnand %p1141_p2, %p1135_p13 }
  0x1a   : > { %1145 = shalt.err (!%p1142_p3)
}
  0x1b   : > { %s1199_s12 = smov 128   ;;  %s1200_s18 = smov 8  }
  0x1c   : > { %1025 = dma.hbm_to_vmem [thread:$0]  (!%p1280_p9), %s172_s30, 2048, %s174_s5, %s160_s7, %s1199_s12, %s1199_s12, %s1200_s18  }
  0x1d   : > { %p867_p4 = scmp.ge.s32.totalorder %s1196_s17, 1  ;;  %p181_p5 = scmp.lt.s32.totalorder %s1196_s17, 3 }
  0x1f   : > { %p182_p6 = pnand %p867_p4, %p181_p5 }
  0x20   : > { %s187_s20 = sand.u32 (!%p182_p6), 1, %s1180_s13  }
  0x21   : > { %185 = sbr.rel (%p182_p6) target bundleno = 315 (0x13b), region = 32  ;;  %s868_s21 = sshll.u32 (!%p182_p6), %s187_s20, 7 }
  0x22   : > { %s188_s22 = scalar_lea.sflag (!%p182_p6), [#allocation4], %s187_s20  ;;  %s1291_s25 = scalar_lea.vmem (!%p182_p6), [#allocation3], %s868_s21 }
  0x26   : > { %1171 = dma.done.wait (%p1265_p7), %s188_s22, 2048  }
  0x27   : > { %1173 = vsyncadd (%p1265_p7), %s188_s22, 4294965248  ;;  %v1078_v0 = vld [vmem:[%s1474_s1 + $0x78] sm:$0xff]   ;;  %v1080_v2 = vld [vmem:[%s1474_s1 + $0x70] sm:$0xff]   ;;  %vm238_vm0 = vcmask 261120   ;;  %v1201_v32 = vmov 0.0   ;;  %vm747_vm1 = vcmask 257024  }
  0x28   : > { %v1079_v1 = vld [vmem:[%s1474_s1 + $0x38] sm:$0xff]   ;;  %940 = vmatprep.subr.bf16.mxu0 %v1078_v0  ;;  %1004 = vmatprep.subr.bf16.mxu1 %v1078_v0  ;;  %v1081_v3 = vld [vmem:[%s1474_s1 + $0x30] sm:$0xff]   ;;  %v1082_v4 = vld [vmem:[%s1474_s1 + $0x68] sm:$0xff]   ;;  %239 = vst.msk [vmem:[#allocation2] sm:$0xff] %vm238_vm0, %v1201_v32 }
  0x29   : > { %941 = vmatpush3.bf16.msra.mxu0 %v1079_v1  ;;  %1012 = vmatpush3.bf16.msra.mxu1 %v1079_v1  ;;  %v1083_v5 = vld [vmem:[%s1474_s1 + $0x28] sm:$0xff]   ;;  %v1084_v6 = vld [vmem:[%s1474_s1 + $0x60] sm:$0xff]   ;;  %v1086_v8 = vld [vmem:[%s1474_s1 + $0x58] sm:$0xff]   ;;  %240 = vst.msk [vmem:[#allocation2 + $0x8] sm:$0xff] %vm238_vm0, %v1201_v32 }
  0x2a   : > { %942 = vmatprep.subr.bf16.mxu0 %v1080_v2  ;;  %1005 = vmatprep.subr.bf16.mxu1 %v1080_v2  ;;  %v1085_v7 = vld [vmem:[%s1474_s1 + $0x20] sm:$0xff]   ;;  %v1087_v9 = vld [vmem:[%s1474_s1 + $0x18] sm:$0xff]   ;;  %v1088_v10 = vld [vmem:[%s1474_s1 + $0x50] sm:$0xff]   ;;  %241 = vst.msk [vmem:[#allocation2 + $0x10] sm:$0xff] %vm238_vm0, %v1201_v32 }
  0x2b   : > { %v1096_v11 = vld [vmem:[%s1291_s25 + $0x4] ss:$8 sps:$4 sm:$0xff]   ;;  %v1089_v13 = vld [vmem:[%s1474_s1 + $0x10] sm:$0xff]   ;;  %v1094_v18 = vld [vmem:[%s1291_s25] ss:$8 sps:$4 sm:$0xff]   ;;  %242 = vst.msk [vmem:[#allocation2 + $0x18] sm:$0xff] %vm238_vm0, %v1201_v32 }
  0x2c   : > { %v1099_v12 = vld [vmem:[%s1291_s25 + $0x44] ss:$8 sps:$4 sm:$0xff]   ;;  %527 = vmatprep.mubr.bf16.mxu0 %v1096_v11  ;;  %v1097_v19 = vld [vmem:[%s1291_s25 + $0x40] ss:$8 sps:$4 sm:$0xff]   ;;  %v1100_v20 = vld [vmem:[%s1291_s25 + $0x14] ss:$8 sps:$4 sm:$0xff]  }
  0x2d   : > { %943 = vmatpush3.bf16.msra.mxu0 %v1081_v3  ;;  %1013 = vmatpush3.bf16.msra.mxu1 %v1081_v3  ;;  %v1090_v14 = vld [vmem:[%s1474_s1 + $0x48] sm:$0xff]   ;;  %v1092_v16 = vld [vmem:[%s1474_s1 + $0x40] sm:$0xff]   ;;  %v1102_v21 = vld [vmem:[%s1291_s25 + $0x54] ss:$8 sps:$4 sm:$0xff]   ;;  %243 = vst.msk [vmem:[#allocation2 + $0x20] sm:$0xff] %vm238_vm0, %v1201_v32 }
  0x2e   : > { %944 = vmatprep.subr.bf16.mxu0 %v1082_v4  ;;  %1006 = vmatprep.subr.bf16.mxu1 %v1082_v4  ;;  %v1091_v15 = vld [vmem:[%s1474_s1 + $0x8] sm:$0xff]   ;;  %v1093_v17 = vld [vmem:[%s1474_s1] sm:$0xff]   ;;  %v1104_v22 = vld [vmem:[%s1291_s25 + $0x10] ss:$8 sps:$4 sm:$0xff]   ;;  %244 = vst.msk [vmem:[#allocation2 + $0x28] sm:$0xff] %vm238_vm0, %v1201_v32 }
  0x2f   : > { %559 = vmatprep.mubr.bf16.mxu1 %v1099_v12  ;;  %v1105_v23 = vld [vmem:[%s1291_s25 + $0x50] ss:$8 sps:$4 sm:$0xff]   ;;  %v1106_v24 = vld [vmem:[%s1291_s25 + $0x24] ss:$8 sps:$4 sm:$0xff]   ;;  %v1110_v26 = vld [vmem:[%s1291_s25 + $0x20] ss:$8 sps:$4 sm:$0xff]  }
  0x30   : > { %v1108_v25 = vld [vmem:[%s1291_s25 + $0x64] ss:$8 sps:$4 sm:$0xff]   ;;  %v1111_v27 = vld [vmem:[%s1291_s25 + $0x60] ss:$8 sps:$4 sm:$0xff]   ;;  %v1112_v28 = vld [vmem:[%s1291_s25 + $0x34] ss:$8 sps:$4 sm:$0xff]  }
  0x31   : > { %945 = vmatpush3.bf16.msra.mxu0 %v1083_v5  ;;  %1014 = vmatpush3.bf16.msra.mxu1 %v1083_v5  ;;  %v1114_v29 = vld [vmem:[%s1291_s25 + $0x74] ss:$8 sps:$4 sm:$0xff]   ;;  %v1116_v30 = vld [vmem:[%s1291_s25 + $0x30] ss:$8 sps:$4 sm:$0xff]   ;;  %245 = vst.msk [vmem:[#allocation2 + $0x30] sm:$0xff] %vm238_vm0, %v1201_v32  ;;  %246 = vst.msk [vmem:[#allocation2 + $0x38] sm:$0xff] %vm238_vm0, %v1201_v32 }
  0x32   : > { %946 = vmatprep.subr.bf16.mxu0 %v1084_v6  ;;  %1007 = vmatprep.subr.bf16.mxu1 %v1084_v6  ;;  %v1117_v31 = vld [vmem:[%s1291_s25 + $0x70] ss:$8 sps:$4 sm:$0xff]   ;;  %247 = vst.msk [vmem:[#allocation2 + $0x40] sm:$0xff] %vm238_vm0, %v1201_v32  ;;  %248 = vst.msk [vmem:[#allocation2 + $0x48] sm:$0xff] %vm238_vm0, %v1201_v32  ;;  %v255_v35 = vld [vmem:[#allocation2] sm:$0xff]  ;;  %s869_s25 = sshll.u32 %s1188_s15, 4 }
  0x33   : > { %249 = vst.msk [vmem:[#allocation2 + $0x50] sm:$0xff] %vm238_vm0, %v1201_v32  ;;  %250 = vst.msk [vmem:[#allocation2 + $0x58] sm:$0xff] %vm238_vm0, %v1201_v32  ;;  %v256_v45 = vld [vmem:[#allocation2 + $0x8] sm:$0xff]  ;;  %p228_p7 = scmp.lt.s32.totalorder %s869_s25, 31  ;;  %v257_v55 = vld [vmem:[#allocation2 + $0x10] sm:$0xff] }
  0x34   : > { %251 = vst.msk [vmem:[#allocation2 + $0x60] sm:$0xff] %vm238_vm0, %v1201_v32  ;;  %252 = vst.msk [vmem:[#allocation2 + $0x68] sm:$0xff] %vm238_vm0, %v1201_v32  ;;  %v1387_v61 = vld [vmem:[%s1475_s2] ss:$0 sm:$0xff]  ;;  %v258_v2 = vld [vmem:[#allocation2 + $0x18] sm:$0xff] }
  0x35   : > { %947 = vmatpush3.bf16.msra.mxu0 %v1085_v7  ;;  %1015 = vmatpush3.bf16.msra.mxu1 %v1085_v7  ;;  %253 = vst.msk [vmem:[#allocation2 + $0x70] sm:$0xff] %vm238_vm0, %v1201_v32  ;;  %254 = vst.msk [vmem:[#allocation2 + $0x78] sm:$0xff] %vm238_vm0, %v1201_v32  ;;  %s1488_s25 = smov (!%p228_p7, %s869_s25), 31 }
  0x36   : > { %948 = vmatprep.subr.bf16.mxu0 %v1086_v8  ;;  %1008 = vmatprep.subr.bf16.mxu1 %v1086_v8  ;;  %s870_s12 = sshll.u32 %s1488_s25, 2 }
  0x37   : > { %s1397_s21 = scalar_lea.vmem %s1476_s3, %s870_s12 }
  0x39   : > { %949 = vmatpush3.bf16.msra.mxu0 %v1087_v9  ;;  %1016 = vmatpush3.bf16.msra.mxu1 %v1087_v9  ;;  %v263_v37 = vld [vmem:[#allocation2 + $0x40] sm:$0xff]  ;;  %v264_v47 = vld [vmem:[#allocation2 + $0x48] sm:$0xff] }
  0x3a   : > { %950 = vmatprep.subr.bf16.mxu0 %v1088_v10  ;;  %1009 = vmatprep.subr.bf16.mxu1 %v1088_v10  ;;  %v265_v57 = vld [vmem:[#allocation2 + $0x50] sm:$0xff]  ;;  %v266_v6 = vld [vmem:[#allocation2 + $0x58] sm:$0xff] }
  0x3d   : > { %951 = vmatpush3.bf16.msra.mxu0 %v1089_v13  ;;  %1017 = vmatpush3.bf16.msra.mxu1 %v1089_v13 }
  0x3e   : > { %952 = vmatprep.subr.bf16.mxu0 %v1090_v14  ;;  %1010 = vmatprep.subr.bf16.mxu1 %v1090_v14 }
  0x41   : > { %953 = vmatpush3.bf16.msra.mxu0 %v1091_v15  ;;  %1018 = vmatpush3.bf16.msra.mxu1 %v1091_v15 }
  0x42   : > { %954 = vmatprep.subr.bf16.mxu0 %v1092_v16  ;;  %1011 = vmatprep.subr.bf16.mxu1 %v1092_v16 }
  0x45   : > { %955 = vmatpush3.bf16.msra.mxu0 %v1093_v17  ;;  %1019 = vmatpush3.bf16.msra.mxu1 %v1093_v17 }
  0x48   : > { %528 = vmatmul.mubr.bf16.vlgmr.msra.gmra.mxu0 %v1094_v18  ;;  %560 = vmatmul.mubr.bf16.vlgmr.msra.gmra.mxu1 %v1097_v19 }
  0x49   : > { %535 = vmatprep.mubr.bf16.mxu0 %v1100_v20  ;;  %567 = vmatprep.mubr.bf16.mxu1 %v1102_v21 }
  0x50   : > { %536 = vmatmul.mubr.bf16.gmra.mxu0 %v1104_v22  ;;  %568 = vmatmul.mubr.bf16.gmra.mxu1 %v1105_v23 }
  0x51   : > { %543 = vmatprep.mubr.bf16.mxu0 %v1106_v24  ;;  %575 = vmatprep.mubr.bf16.mxu1 %v1108_v25 }
  0x58   : > { %544 = vmatmul.mubr.bf16.gmra.mxu0 %v1110_v26  ;;  %576 = vmatmul.mubr.bf16.gmra.mxu1 %v1111_v27  ;;  %v259_v26 = vld [vmem:[#allocation2 + $0x20] sm:$0xff] }
  0x59   : > { %551 = vmatprep.mubr.bf16.mxu0 %v1112_v28  ;;  %583 = vmatprep.mubr.bf16.mxu1 %v1114_v29  ;;  %v267_v27 = vld [vmem:[#allocation2 + $0x60] sm:$0xff] }
  0x60   : > { %552 = vmatmul.mubr.bf16.gmra.mxu0 %v1116_v30  ;;  %584 = vmatmul.mubr.bf16.gmra.mxu1 %v1117_v31 }
 0x108   : > { %v956_v33 = vpop.f32.mrf.mxu0  ;;  %v980_v34 = vpop.f32.mrf.mxu1 }
 0x10a   : > { %v957_v36 = vpop.f32.mrf.mxu0  ;;  %v981_v38 = vpop.f32.mrf.mxu1 }
 0x10b   : > { %v958_v39 = vadd.f32 %v957_v36, %v956_v33  ;;  %v982_v40 = vadd.f32 %v981_v38, %v980_v34 }
 0x10c   : > { %v959_v41 = vpop.f32.mrf.mxu0  ;;  %v983_v42 = vpop.f32.mrf.mxu1 }
 0x10d   : > { %v592_v43 = vadd.f32 %v958_v39, %v255_v35  ;;  %v600_v44 = vadd.f32 %v982_v40, %v263_v37 }
 0x10e   : > { %v960_v46 = vpop.f32.mrf.mxu0  ;;  %v984_v48 = vpop.f32.mrf.mxu1 }
 0x10f   : > { %609 = vst.msk [vmem:[#allocation2] sm:$0xff] %vm238_vm0, %v592_v43  ;;  %617 = vst.msk [vmem:[#allocation2 + $0x40] sm:$0xff] %vm238_vm0, %v600_v44  ;;  %v961_v49 = vadd.f32 %v960_v46, %v959_v41  ;;  %v985_v50 = vadd.f32 %v984_v48, %v983_v42  ;;  %v260_v44 = vld [vmem:[#allocation2 + $0x28] sm:$0xff] }
 0x110   : > { %v962_v51 = vpop.f32.mrf.mxu0  ;;  %v986_v52 = vpop.f32.mrf.mxu1 }
 0x111   : > { %v593_v53 = vadd.f32 %v961_v49, %v256_v45  ;;  %v601_v54 = vadd.f32 %v985_v50, %v264_v47  ;;  %v268_v45 = vld [vmem:[#allocation2 + $0x68] sm:$0xff] }
 0x112   : > { %v963_v56 = vpop.f32.mrf.mxu0  ;;  %v987_v58 = vpop.f32.mrf.mxu1 }
 0x113   : > { %610 = vst.msk [vmem:[#allocation2 + $0x8] sm:$0xff] %vm238_vm0, %v593_v53  ;;  %618 = vst.msk [vmem:[#allocation2 + $0x48] sm:$0xff] %vm238_vm0, %v601_v54  ;;  %v964_v59 = vadd.f32 %v963_v56, %v962_v51  ;;  %v988_v60 = vadd.f32 %v987_v58, %v986_v52 }
 0x114   : > { %v965_v62 = vpop.f32.mrf.mxu0  ;;  %v989_v63 = vpop.f32.mrf.mxu1 }
 0x115   : > { %v594_v0 = vadd.f32 %v964_v59, %v257_v55  ;;  %v602_v1 = vadd.f32 %v988_v60, %v265_v57 }
 0x116   : > { %v628_v3 = vld [vmem:[#allocation2] sm:$0xff]  ;;  %v966_v5 = vpop.f32.mrf.mxu0  ;;  %v990_v7 = vpop.f32.mrf.mxu1 }
 0x117   : > { %v636_v4 = vld [vmem:[#allocation2 + $0x40] sm:$0xff]  ;;  %v651_v8 = vadd.f32 %v1387_v61, %v628_v3  ;;  %611 = vst.msk [vmem:[#allocation2 + $0x10] sm:$0xff] %vm238_vm0, %v594_v0  ;;  %619 = vst.msk [vmem:[#allocation2 + $0x50] sm:$0xff] %vm238_vm0, %v602_v1  ;;  %v967_v10 = vadd.f32 %v966_v5, %v965_v62  ;;  %v991_v11 = vadd.f32 %v990_v7, %v989_v63  ;;  %v261_v63 = vld [vmem:[#allocation2 + $0x30] sm:$0xff] }
 0x118   : > { %v659_v9 = vadd.f32 %v1387_v61, %v636_v4  ;;  %v968_v12 = vpop.f32.mrf.mxu0  ;;  %v992_v13 = vpop.f32.mrf.mxu1  ;;  %v269_v0 = vld [vmem:[#allocation2 + $0x70] sm:$0xff] }
 0x119   : > { %v667_v14 = vmax.f32 %v651_v8, 0.0  ;;  %v595_v16 = vadd.f32 %v967_v10, %v258_v2  ;;  %v603_v17 = vadd.f32 %v991_v11, %v266_v6  ;;  %v270_v11 = vld [vmem:[#allocation2 + $0x78] sm:$0xff] }
 0x11a   : > { %v675_v15 = vmax.f32 %v659_v9, 0.0  ;;  %v629_v18 = vld [vmem:[#allocation2 + $0x8] sm:$0xff]  ;;  %v969_v20 = vpop.f32.mrf.mxu0  ;;  %v993_v21 = vpop.f32.mrf.mxu1  ;;  %v262_v9 = vld [vmem:[#allocation2 + $0x38] sm:$0xff] }
 0x11b   : > { %v637_v19 = vld [vmem:[#allocation2 + $0x48] sm:$0xff]  ;;  %v924_v22 = vpack.c.bf16 %v667_v14, %v667_v14  ;;  %v652_v24 = vadd.f32 %v1387_v61, %v629_v18  ;;  %612 = vst.msk [vmem:[#allocation2 + $0x18] sm:$0xff] %vm238_vm0, %v595_v16  ;;  %620 = vst.msk [vmem:[#allocation2 + $0x58] sm:$0xff] %vm238_vm0, %v603_v17  ;;  %v970_v28 = vadd.f32 %v969_v20, %v968_v12 }
 0x11c   : > { %v932_v23 = vpack.c.bf16 %v675_v15, %v675_v15  ;;  %v660_v25 = vadd.f32 %v1387_v61, %v637_v19  ;;  %v994_v29 = vadd.f32 %v993_v21, %v992_v13  ;;  %v971_v30 = vpop.f32.mrf.mxu0  ;;  %v995_v31 = vpop.f32.mrf.mxu1 }
 0x11d   : > { %748 = vst.msk [vmem:[%s1397_s21] sm:$0xf] %vm747_vm1, %v924_v22  ;;  %v668_v32 = vmax.f32 %v652_v24, 0.0  ;;  %v596_v36 = vadd.f32 %v970_v28, %v259_v26 }
 0x11e   : > { %756 = vst.msk [vmem:[%s1397_s21 + $0x20] sm:$0xf] %vm747_vm1, %v932_v23  ;;  %v676_v33 = vmax.f32 %v660_v25, 0.0  ;;  %v630_v34 = vld [vmem:[#allocation2 + $0x10] sm:$0xff]  ;;  %v604_v37 = vadd.f32 %v994_v29, %v267_v27  ;;  %v972_v38 = vpop.f32.mrf.mxu0  ;;  %v996_v39 = vpop.f32.mrf.mxu1 }
 0x11f   : > { %v638_v35 = vld [vmem:[#allocation2 + $0x50] sm:$0xff]  ;;  %v925_v40 = vpack.c.bf16 %v668_v32, %v668_v32  ;;  %v653_v42 = vadd.f32 %v1387_v61, %v630_v34  ;;  %613 = vst.msk [vmem:[#allocation2 + $0x20] sm:$0xff] %vm238_vm0, %v596_v36  ;;  %v973_v46 = vadd.f32 %v972_v38, %v971_v30  ;;  %v997_v47 = vadd.f32 %v996_v39, %v995_v31 }
 0x120   : > { %v933_v41 = vpack.c.bf16 %v676_v33, %v676_v33  ;;  %v661_v43 = vadd.f32 %v1387_v61, %v638_v35  ;;  %621 = vst.msk [vmem:[#allocation2 + $0x60] sm:$0xff] %vm238_vm0, %v604_v37  ;;  %v974_v48 = vpop.f32.mrf.mxu0  ;;  %v998_v49 = vpop.f32.mrf.mxu1 }
 0x121   : > { %749 = vst.msk [vmem:[%s1397_s21 + $0x4] sm:$0xf] %vm747_vm1, %v925_v40  ;;  %v669_v50 = vmax.f32 %v653_v42, 0.0  ;;  %v597_v54 = vadd.f32 %v973_v46, %v260_v44  ;;  %v605_v55 = vadd.f32 %v997_v47, %v268_v45 }
 0x122   : > { %757 = vst.msk [vmem:[%s1397_s21 + $0x24] sm:$0xf] %vm747_vm1, %v933_v41  ;;  %v677_v51 = vmax.f32 %v661_v43, 0.0  ;;  %v631_v52 = vld [vmem:[#allocation2 + $0x18] sm:$0xff]  ;;  %v975_v56 = vpop.f32.mrf.mxu0  ;;  %v999_v57 = vpop.f32.mrf.mxu1 }
 0x123   : > { %v639_v53 = vld [vmem:[#allocation2 + $0x58] sm:$0xff]  ;;  %v926_v58 = vpack.c.bf16 %v669_v50, %v669_v50  ;;  %v654_v60 = vadd.f32 %v1387_v61, %v631_v52  ;;  %614 = vst.msk [vmem:[#allocation2 + $0x28] sm:$0xff] %vm238_vm0, %v597_v54  ;;  %622 = vst.msk [vmem:[#allocation2 + $0x68] sm:$0xff] %vm238_vm0, %v605_v55  ;;  %v976_v1 = vadd.f32 %v975_v56, %v974_v48 }
 0x124   : > { %v934_v59 = vpack.c.bf16 %v677_v51, %v677_v51  ;;  %v662_v62 = vadd.f32 %v1387_v61, %v639_v53  ;;  %v1000_v2 = vadd.f32 %v999_v57, %v998_v49  ;;  %v977_v3 = vpop.f32.mrf.mxu0  ;;  %v1001_v4 = vpop.f32.mrf.mxu1 }
 0x125   : > { %750 = vst.msk [vmem:[%s1397_s21 + $0x8] sm:$0xf] %vm747_vm1, %v926_v58  ;;  %v670_v5 = vmax.f32 %v654_v60, 0.0  ;;  %v598_v7 = vadd.f32 %v976_v1, %v261_v63 }
 0x126   : > { %758 = vst.msk [vmem:[%s1397_s21 + $0x28] sm:$0xf] %vm747_vm1, %v934_v59  ;;  %v678_v6 = vmax.f32 %v662_v62, 0.0  ;;  %v606_v8 = vadd.f32 %v1000_v2, %v269_v0  ;;  %v978_v10 = vpop.f32.mrf.mxu0  ;;  %v1002_v12 = vpop.f32.mrf.mxu1  ;;  %v632_v15 = vld [vmem:[#allocation2 + $0x20] sm:$0xff] }
 0x127   : > { %v927_v13 = vpack.c.bf16 %v670_v5, %v670_v5  ;;  %v640_v16 = vld [vmem:[#allocation2 + $0x60] sm:$0xff]  ;;  %v979_v17 = vadd.f32 %v978_v10, %v977_v3  ;;  %v1003_v18 = vadd.f32 %v1002_v12, %v1001_v4  ;;  %v655_v19 = vadd.f32 %v1387_v61, %v632_v15  ;;  %615 = vst.msk [vmem:[#allocation2 + $0x30] sm:$0xff] %vm238_vm0, %v598_v7 }
 0x128   : > { %v935_v14 = vpack.c.bf16 %v678_v6, %v678_v6  ;;  %v663_v20 = vadd.f32 %v1387_v61, %v640_v16  ;;  %623 = vst.msk [vmem:[#allocation2 + $0x70] sm:$0xff] %vm238_vm0, %v606_v8 }
 0x129   : > { %751 = vst.msk [vmem:[%s1397_s21 + $0xc] sm:$0xf] %vm747_vm1, %v927_v13  ;;  %v599_v21 = vadd.f32 %v979_v17, %v262_v9  ;;  %v607_v22 = vadd.f32 %v1003_v18, %v270_v11  ;;  %v671_v23 = vmax.f32 %v655_v19, 0.0 }
 0x12a   : > { %759 = vst.msk [vmem:[%s1397_s21 + $0x2c] sm:$0xf] %vm747_vm1, %v935_v14  ;;  %v679_v24 = vmax.f32 %v663_v20, 0.0  ;;  %v633_v25 = vld [vmem:[#allocation2 + $0x28] sm:$0xff] }
 0x12b   : > { %v641_v26 = vld [vmem:[#allocation2 + $0x68] sm:$0xff]  ;;  %616 = vst.msk [vmem:[#allocation2 + $0x38] sm:$0xff] %vm238_vm0, %v599_v21  ;;  %624 = vst.msk [vmem:[#allocation2 + $0x78] sm:$0xff] %vm238_vm0, %v607_v22  ;;  %v928_v27 = vpack.c.bf16 %v671_v23, %v671_v23  ;;  %v656_v29 = vadd.f32 %v1387_v61, %v633_v25 }
 0x12c   : > { %v936_v28 = vpack.c.bf16 %v679_v24, %v679_v24  ;;  %v664_v30 = vadd.f32 %v1387_v61, %v641_v26 }
 0x12d   : > { %752 = vst.msk [vmem:[%s1397_s21 + $0x10] sm:$0xf] %vm747_vm1, %v928_v27  ;;  %v672_v31 = vmax.f32 %v656_v29, 0.0 }
 0x12e   : > { %760 = vst.msk [vmem:[%s1397_s21 + $0x30] sm:$0xf] %vm747_vm1, %v936_v28  ;;  %v680_v32 = vmax.f32 %v664_v30, 0.0  ;;  %v634_v33 = vld [vmem:[#allocation2 + $0x30] sm:$0xff] }
 0x12f   : > { %v642_v34 = vld [vmem:[#allocation2 + $0x70] sm:$0xff]  ;;  %v929_v35 = vpack.c.bf16 %v672_v31, %v672_v31  ;;  %v657_v37 = vadd.f32 %v1387_v61, %v634_v33 }
 0x130   : > { %v937_v36 = vpack.c.bf16 %v680_v32, %v680_v32  ;;  %v665_v38 = vadd.f32 %v1387_v61, %v642_v34 }
 0x131   : > { %753 = vst.msk [vmem:[%s1397_s21 + $0x14] sm:$0xf] %vm747_vm1, %v929_v35  ;;  %v673_v39 = vmax.f32 %v657_v37, 0.0 }
 0x132   : > { %761 = vst.msk [vmem:[%s1397_s21 + $0x34] sm:$0xf] %vm747_vm1, %v937_v36  ;;  %v681_v40 = vmax.f32 %v665_v38, 0.0  ;;  %v635_v41 = vld [vmem:[#allocation2 + $0x38] sm:$0xff] }
 0x133   : > { %v643_v42 = vld [vmem:[#allocation2 + $0x78] sm:$0xff]  ;;  %v658_v43 = vadd.f32 %v1387_v61, %v635_v41  ;;  %v930_v45 = vpack.c.bf16 %v673_v39, %v673_v39 }
 0x134   : > { %v666_v44 = vadd.f32 %v1387_v61, %v643_v42  ;;  %v938_v46 = vpack.c.bf16 %v681_v40, %v681_v40 }
 0x135   : > { %v674_v47 = vmax.f32 %v658_v43, 0.0  ;;  %754 = vst.msk [vmem:[%s1397_s21 + $0x18] sm:$0xf] %vm747_vm1, %v930_v45 }
 0x136   : > { %v682_v48 = vmax.f32 %v666_v44, 0.0  ;;  %762 = vst.msk [vmem:[%s1397_s21 + $0x38] sm:$0xf] %vm747_vm1, %v938_v46 }
 0x137   : > { %v931_v49 = vpack.c.bf16 %v674_v47, %v674_v47 }
 0x138   : > { %v939_v50 = vpack.c.bf16 %v682_v48, %v682_v48 }
 0x139   : > { %755 = vst.msk [vmem:[%s1397_s21 + $0x1c] sm:$0xf] %vm747_vm1, %v931_v49 }
 0x13a   : > { %763 = vst.msk [vmem:[%s1397_s21 + $0x3c] sm:$0xf] %vm747_vm1, %v939_v50 }
 0x13b PF: > { %s16_s17 = sadd.s32 1, %s1196_s17   ;;  %s1480_s12 = smov %s1180_s13 }
 0x13c   : > { %p13_p8 = scmp.ge.s32.totalorder %s16_s17, 4   ;;  %s1481_s13 = smov %s1184_s14 }
 0x13d   : > { %s1482_s14 = smov %s1271_s24  ;;  %s1483_s15 = smov %s1192_s16 }
 0x13e   : > { %s1484_s16 = smov %s1486_s19  ;;  %15 = sbr.rel (!%p13_p8) target bundleno = 4 (0x4), region = 83 }
 0x143   :  { %786 = vsyncpa [#allocation4], 1 }
 0x144   :  { %788 = vsyncpa [#allocation4 + $0x1], 1 }

// kernel: gcn_net1_forward.3
= control target key start
LH: loop header
LB: loop body
LE: loop exit
PB: predicated region body
PF: predicated region fallthrough
CT: control target
= control target key end

     0   :  { %s1669_s18 = smov 0   ;;  %s1671_s19 = smov 0   ;;  %s2153_s0 = inlined_call_operand.vmem [shape: bf16[256,256], index: 0, kind: input, shape index: {}]   ;;  %s2154_s1 = inlined_call_operand.vmem [shape: bf16[256,16], index: 1, kind: input, shape index: {}]   ;;  %s2155_s2 = inlined_call_operand.vmem [shape: f32[1,16], index: 2, kind: input, shape index: {}]   ;;  %s2156_s3 = inlined_call_operand.vmem [shape: f32[16,8], index: 3, kind: input, shape index: {}]   ;;  %s2157_s4 = inlined_call_operand.vmem [shape: f32[1,8], index: 4, kind: input, shape index: {}]   ;;  %s2158_s5 = inlined_call_operand.vmem [shape: f32[256,128], index: 5, kind: output, shape index: {}]  }
   0x1   :  { %s1673_s20 = smov 0  }
   0x2 LB: > { %s27_s21 = sadd.s32 1, %s1631_s19  ;;  %p1298_p0 = scmp.ge.s32.totalorder %s1635_s20, 1  ;;  %s1635_s20 = sphi %s1673_s20, %s15_s20   ;;  %s1631_s19 = sphi %s1671_s19, %s2160_s19   ;;  %s1627_s18 = sphi %s1669_s18, %s2159_s18  }
   0x3   : > { %p29_p1 = scmp.ge.s32.totalorder %s27_s21, 2  ;;  %p219_p2 = scmp.lt.s32.totalorder %s1635_s20, 3 }
   0x5   : > { %s2162_s21 = smov (%p29_p1, %s27_s21), 0  ;;  %p220_p3 = pnand %p1298_p0, %p219_p2 }
   0x6   : > { %s1299_s24 = sshll.u32 (!%p220_p3), %s1627_s18, 4  ;;  %s1638_s23 = smov (!%p220_p3), 8  }
   0x7   : > { %223 = sbr.rel (%p220_p3) target bundleno = 820 (0x334), region = 40  ;;  %p259_p4 = scmp.lt.s32.totalorder (!%p220_p3), %s1299_s24, 31 }
   0xc   : > { %v1509_v0 = vld [vmem:[%s2154_s1 + $0x78] sm:$0xff]   ;;  %v1511_v2 = vld [vmem:[%s2154_s1 + $0x70] sm:$0xff]   ;;  %v1513_v4 = vld [vmem:[%s2154_s1 + $0x68] sm:$0xff]   ;;  %s2164_s24 = smov (!%p259_p4, %s1299_s24), 31  ;;  %vm286_vm0 = vcmask 130048   ;;  %v1637_v32 = vmov 0.0  }
   0xd   : > { %v1510_v1 = vld [vmem:[%s2154_s1 + $0x38] sm:$0xff]   ;;  %1357 = vmatprep.subr.bf16.mxu0 %v1509_v0  ;;  %1467 = vmatprep.subr.bf16.mxu1 %v1509_v0  ;;  %v1512_v3 = vld [vmem:[%s2154_s1 + $0x30] sm:$0xff]   ;;  %v1514_v5 = vld [vmem:[%s2154_s1 + $0x28] sm:$0xff]   ;;  %s1356_s14 = sshll.u32 %s2164_s24, 3  ;;  %287 = vst.msk [vmem:[#allocation2] sm:$0xff] %vm286_vm0, %v1637_v32  ;;  %vm917_vm1 = vcmask 64512  }
   0xe   : > { %1358 = vmatpush3.bf16.msra.mxu0 %v1510_v1  ;;  %1475 = vmatpush3.bf16.msra.mxu1 %v1510_v1  ;;  %v1515_v6 = vld [vmem:[%s2154_s1 + $0x60] sm:$0xff]   ;;  %v1517_v8 = vld [vmem:[%s2154_s1 + $0x58] sm:$0xff]   ;;  %s1722_s22 = scalar_lea.vmem %s2153_s0, %s1356_s14  ;;  %v1519_v10 = vld [vmem:[%s2154_s1 + $0x50] sm:$0xff]   ;;  %288 = vst.msk [vmem:[#allocation2 + $0x8] sm:$0xff] %vm286_vm0, %v1637_v32  ;;  %vm1174_vm2 = vcmask 195584   ;;  %s2065_s29 = scalar_lea.vmem %s2158_s5, %s1356_s14 }
   0xf   : > { %1359 = vmatprep.subr.bf16.mxu0 %v1511_v2  ;;  %1468 = vmatprep.subr.bf16.mxu1 %v1511_v2  ;;  %v1516_v7 = vld [vmem:[%s2154_s1 + $0x20] sm:$0xff]   ;;  %v1518_v9 = vld [vmem:[%s2154_s1 + $0x18] sm:$0xff]   ;;  %v1520_v12 = vld [vmem:[%s2154_s1 + $0x10] sm:$0xff]   ;;  %289 = vst.msk [vmem:[#allocation2 + $0x10] sm:$0xff] %vm286_vm0, %v1637_v32 }
  0x10   : > { %v1527_v11 = vld [vmem:[%s1722_s22 + $0x4] ss:$8 sps:$4 sm:$0xff]   ;;  %v1525_v18 = vld [vmem:[%s1722_s22] ss:$8 sps:$4 sm:$0xff]   ;;  %v1528_v19 = vld [vmem:[%s1722_s22 + $0x14] ss:$8 sps:$4 sm:$0xff]  }
  0x11   : > { %575 = vmatprep.mubr.bf16.mxu0 %v1527_v11  ;;  %v1521_v13 = vld [vmem:[%s2154_s1 + $0x48] sm:$0xff]   ;;  %v1523_v16 = vld [vmem:[%s2154_s1 + $0x40] sm:$0xff]   ;;  %v1546_v21 = vld [vmem:[%s1722_s22 + $0x74] ss:$8 sps:$4 sm:$0xff]   ;;  %290 = vst.msk [vmem:[#allocation2 + $0x18] sm:$0xff] %vm286_vm0, %v1637_v32 }
  0x12   : > { %1360 = vmatpush3.bf16.msra.mxu0 %v1512_v3  ;;  %1476 = vmatpush3.bf16.msra.mxu1 %v1512_v3  ;;  %v1522_v14 = vld [vmem:[%s2154_s1 + $0x8] sm:$0xff]   ;;  %v1524_v17 = vld [vmem:[%s2154_s1] sm:$0xff]   ;;  %v1530_v22 = vld [vmem:[%s1722_s22 + $0x10] ss:$8 sps:$4 sm:$0xff]   ;;  %291 = vst.msk [vmem:[#allocation2 + $0x20] sm:$0xff] %vm286_vm0, %v1637_v32 }
  0x13   : > { %1361 = vmatprep.subr.bf16.mxu0 %v1513_v4  ;;  %1469 = vmatprep.subr.bf16.mxu1 %v1513_v4  ;;  %v1542_v15 = vld [vmem:[%s1722_s22 + $0x64] ss:$8 sps:$4 sm:$0xff]   ;;  %v1540_v20 = vld [vmem:[%s1722_s22 + $0x60] ss:$8 sps:$4 sm:$0xff]   ;;  %v1548_v24 = vld [vmem:[%s1722_s22 + $0x70] ss:$8 sps:$4 sm:$0xff]  }
  0x14   : > { %623 = vmatprep.mubr.bf16.mxu1 %v1542_v15  ;;  %v1531_v23 = vld [vmem:[%s1722_s22 + $0x24] ss:$8 sps:$4 sm:$0xff]   ;;  %v1533_v25 = vld [vmem:[%s1722_s22 + $0x20] ss:$8 sps:$4 sm:$0xff]   ;;  %v1534_v26 = vld [vmem:[%s1722_s22 + $0x34] ss:$8 sps:$4 sm:$0xff]  }
  0x15   : > { %v1536_v27 = vld [vmem:[%s1722_s22 + $0x30] ss:$8 sps:$4 sm:$0xff]   ;;  %v1537_v28 = vld [vmem:[%s1722_s22 + $0x44] ss:$8 sps:$4 sm:$0xff]   ;;  %v1539_v29 = vld [vmem:[%s1722_s22 + $0x40] ss:$8 sps:$4 sm:$0xff]  }
  0x16   : > { %1362 = vmatpush3.bf16.msra.mxu0 %v1514_v5  ;;  %1477 = vmatpush3.bf16.msra.mxu1 %v1514_v5  ;;  %v1543_v30 = vld [vmem:[%s1722_s22 + $0x54] ss:$8 sps:$4 sm:$0xff]   ;;  %v1545_v31 = vld [vmem:[%s1722_s22 + $0x50] ss:$8 sps:$4 sm:$0xff]   ;;  %292 = vst.msk [vmem:[#allocation2 + $0x28] sm:$0xff] %vm286_vm0, %v1637_v32  ;;  %293 = vst.msk [vmem:[#allocation2 + $0x30] sm:$0xff] %vm286_vm0, %v1637_v32 }
  0x17   : > { %1363 = vmatprep.subr.bf16.mxu0 %v1515_v6  ;;  %1470 = vmatprep.subr.bf16.mxu1 %v1515_v6  ;;  %294 = vst.msk [vmem:[#allocation2 + $0x38] sm:$0xff] %vm286_vm0, %v1637_v32  ;;  %295 = vst.msk [vmem:[#allocation2 + $0x40] sm:$0xff] %vm286_vm0, %v1637_v32  ;;  %v716_v33 = vld [vmem:[%s2156_s3 + $0x8] sm:$0xff]  ;;  %v715_v34 = vld [vmem:[%s2156_s3] sm:$0xff] }
  0x18   : > { %296 = vst.msk [vmem:[#allocation2 + $0x48] sm:$0xff] %vm286_vm0, %v1637_v32  ;;  %297 = vst.msk [vmem:[#allocation2 + $0x50] sm:$0xff] %vm286_vm0, %v1637_v32  ;;  %v303_v37 = vld [vmem:[#allocation2] sm:$0xff]  ;;  %v304_v46 = vld [vmem:[#allocation2 + $0x8] sm:$0xff] }
  0x19   : > { %298 = vst.msk [vmem:[#allocation2 + $0x58] sm:$0xff] %vm286_vm0, %v1637_v32  ;;  %299 = vst.msk [vmem:[#allocation2 + $0x60] sm:$0xff] %vm286_vm0, %v1637_v32  ;;  %v305_v56 = vld [vmem:[#allocation2 + $0x10] sm:$0xff]  ;;  %v1789_v63 = vld [vmem:[%s2155_s2] ss:$0 sm:$0xff] }
  0x1a   : > { %1364 = vmatpush3.bf16.msra.mxu0 %v1516_v7  ;;  %1478 = vmatpush3.bf16.msra.mxu1 %v1516_v7  ;;  %300 = vst.msk [vmem:[#allocation2 + $0x68] sm:$0xff] %vm286_vm0, %v1637_v32  ;;  %301 = vst.msk [vmem:[#allocation2 + $0x70] sm:$0xff] %vm286_vm0, %v1637_v32  ;;  %v306_v3 = vld [vmem:[#allocation2 + $0x18] sm:$0xff] }
  0x1b   : > { %1365 = vmatprep.subr.bf16.mxu0 %v1517_v8  ;;  %1471 = vmatprep.subr.bf16.mxu1 %v1517_v8  ;;  %302 = vst.msk [vmem:[#allocation2 + $0x78] sm:$0xff] %vm286_vm0, %v1637_v32 }
  0x1e   : > { %1366 = vmatpush3.bf16.msra.mxu0 %v1518_v9  ;;  %1479 = vmatpush3.bf16.msra.mxu1 %v1518_v9 }
  0x1f   : > { %1367 = vmatprep.subr.bf16.mxu0 %v1519_v10  ;;  %1472 = vmatprep.subr.bf16.mxu1 %v1519_v10 }
  0x20   : > { %v315_v40 = vld [vmem:[#allocation2 + $0x60] sm:$0xff] }
  0x21   : > { %v316_v50 = vld [vmem:[#allocation2 + $0x68] sm:$0xff]  ;;  %v317_v60 = vld [vmem:[#allocation2 + $0x70] sm:$0xff] }
  0x22   : > { %1368 = vmatpush3.bf16.msra.mxu0 %v1520_v12  ;;  %1480 = vmatpush3.bf16.msra.mxu1 %v1520_v12  ;;  %v318_v9 = vld [vmem:[#allocation2 + $0x78] sm:$0xff] }
  0x23   : > { %1369 = vmatprep.subr.bf16.mxu0 %v1521_v13  ;;  %1473 = vmatprep.subr.bf16.mxu1 %v1521_v13 }
  0x26   : > { %1370 = vmatpush3.bf16.msra.mxu0 %v1522_v14  ;;  %1481 = vmatpush3.bf16.msra.mxu1 %v1522_v14  ;;  %v307_v14 = vld [vmem:[#allocation2 + $0x20] sm:$0xff] }
  0x27   : > { %1371 = vmatprep.subr.bf16.mxu0 %v1523_v16  ;;  %1474 = vmatprep.subr.bf16.mxu1 %v1523_v16 }
  0x2a   : > { %1372 = vmatpush3.bf16.msra.mxu0 %v1524_v17  ;;  %1482 = vmatpush3.bf16.msra.mxu1 %v1524_v17 }
  0x2b   : > { %1439 = vmatprep.subr.mxu1 %v716_v33 }
  0x2d   : > { %576 = vmatmul.mubr.bf16.vlgmr.msra.gmra.mxu0 %v1525_v18  ;;  %624 = vmatmul.mubr.bf16.vlgmr.msra.gmra.mxu1 %v1540_v20 }
  0x2e   : > { %583 = vmatprep.mubr.bf16.mxu0 %v1528_v19  ;;  %631 = vmatprep.mubr.bf16.mxu1 %v1546_v21 }
  0x2f   : > { %1440 = vmatpush3.msra.mxu1 %v716_v33 }
  0x30   : > { %1441 = vmatprep.subr.mxu1 %v715_v34 }
  0x31   : > { %1442 = vmatpush3.msra.mxu1 %v715_v34 }
  0x35   : > { %584 = vmatmul.mubr.bf16.gmra.mxu0 %v1530_v22  ;;  %632 = vmatmul.mubr.bf16.gmra.mxu1 %v1548_v24  ;;  %v308_v22 = vld [vmem:[#allocation2 + $0x28] sm:$0xff] }
  0x36   : > { %591 = vmatprep.mubr.bf16.mxu0 %v1531_v23 }
  0x3d   : > { %592 = vmatmul.mubr.bf16.gmra.mxu0 %v1533_v25 }
  0x3e   : > { %599 = vmatprep.mubr.bf16.mxu0 %v1534_v26 }
  0x45   : > { %600 = vmatmul.mubr.bf16.gmra.mxu0 %v1536_v27 }
  0x46   : > { %607 = vmatprep.mubr.bf16.mxu0 %v1537_v28 }
  0x4d   : > { %608 = vmatmul.mubr.bf16.gmra.mxu0 %v1539_v29  ;;  %v309_v29 = vld [vmem:[#allocation2 + $0x30] sm:$0xff] }
  0x4e   : > { %615 = vmatprep.mubr.bf16.mxu0 %v1543_v30 }
  0x55   : > { %616 = vmatmul.mubr.bf16.gmra.mxu0 %v1545_v31 }
  0xed   : > { %v1373_v35 = vpop.f32.mrf.mxu0  ;;  %v1409_v36 = vpop.f32.mrf.mxu1 }
  0xef   : > { %v1374_v38 = vpop.f32.mrf.mxu0  ;;  %v1410_v41 = vpop.f32.mrf.mxu1 }
  0xf0   : > { %v1375_v39 = vadd.f32 %v1374_v38, %v1373_v35  ;;  %v1411_v43 = vadd.f32 %v1410_v41, %v1409_v36  ;;  %v310_v36 = vld [vmem:[#allocation2 + $0x38] sm:$0xff] }
  0xf1   : > { %v1376_v42 = vpop.f32.mrf.mxu0  ;;  %v1412_v45 = vpop.f32.mrf.mxu1 }
  0xf2   : > { %v640_v44 = vadd.f32 %v1375_v39, %v303_v37  ;;  %v652_v48 = vadd.f32 %v1411_v43, %v315_v40  ;;  %v311_v43 = vld [vmem:[#allocation2 + $0x40] sm:$0xff] }
  0xf3   : > { %v1377_v47 = vpop.f32.mrf.mxu0  ;;  %v1413_v51 = vpop.f32.mrf.mxu1 }
  0xf4   : > { %657 = vst.msk [vmem:[#allocation2] sm:$0xff] %vm286_vm0, %v640_v44  ;;  %v1378_v49 = vadd.f32 %v1377_v47, %v1376_v42  ;;  %669 = vst.msk [vmem:[#allocation2 + $0x60] sm:$0xff] %vm286_vm0, %v652_v48  ;;  %v1414_v53 = vadd.f32 %v1413_v51, %v1412_v45 }
  0xf5   : > { %v1379_v52 = vpop.f32.mrf.mxu0  ;;  %v1415_v55 = vpop.f32.mrf.mxu1 }
  0xf6   : > { %v641_v54 = vadd.f32 %v1378_v49, %v304_v46  ;;  %v653_v58 = vadd.f32 %v1414_v53, %v316_v50  ;;  %v312_v50 = vld [vmem:[#allocation2 + $0x48] sm:$0xff] }
  0xf7   : > { %v1380_v57 = vpop.f32.mrf.mxu0  ;;  %v1416_v61 = vpop.f32.mrf.mxu1 }
  0xf8   : > { %658 = vst.msk [vmem:[#allocation2 + $0x8] sm:$0xff] %vm286_vm0, %v641_v54  ;;  %v1381_v59 = vadd.f32 %v1380_v57, %v1379_v52  ;;  %670 = vst.msk [vmem:[#allocation2 + $0x68] sm:$0xff] %vm286_vm0, %v653_v58  ;;  %v1417_v0 = vadd.f32 %v1416_v61, %v1415_v55  ;;  %v313_v57 = vld [vmem:[#allocation2 + $0x50] sm:$0xff] }
  0xf9   : > { %v1382_v62 = vpop.f32.mrf.mxu0  ;;  %v1418_v2 = vpop.f32.mrf.mxu1 }
  0xfa   : > { %v642_v1 = vadd.f32 %v1381_v59, %v305_v56  ;;  %v654_v6 = vadd.f32 %v1417_v0, %v317_v60 }
  0xfb   : > { %v1383_v4 = vpop.f32.mrf.mxu0  ;;  %v676_v5 = vld [vmem:[#allocation2] sm:$0xff]  ;;  %v1419_v10 = vpop.f32.mrf.mxu1 }
  0xfc   : > { %659 = vst.msk [vmem:[#allocation2 + $0x10] sm:$0xff] %vm286_vm0, %v642_v1  ;;  %v1384_v7 = vadd.f32 %v1383_v4, %v1382_v62  ;;  %v699_v8 = vadd.f32 %v1789_v63, %v676_v5  ;;  %671 = vst.msk [vmem:[#allocation2 + $0x70] sm:$0xff] %vm286_vm0, %v654_v6  ;;  %v1420_v12 = vadd.f32 %v1419_v10, %v1418_v2  ;;  %v314_v1 = vld [vmem:[#allocation2 + $0x58] sm:$0xff] }
  0xfd   : > { %v1385_v11 = vpop.f32.mrf.mxu0 }
  0xfe   : > { %v643_v13 = vadd.f32 %v1384_v7, %v306_v3  ;;  %1110 = vrot.lane.b32.xlu0 %v699_v8, %s1638_s23  ;;  %1443 = vmatprep.mubr.msk.f32.mxu1 %vm286_vm0, %v699_v8  ;;  %v655_v17 = vadd.f32 %v1420_v12, %v318_v9 }
  0xff   : > { %v1386_v15 = vpop.f32.mrf.mxu0  ;;  %v677_v16 = vld [vmem:[#allocation2 + $0x8] sm:$0xff] }
 0x100   : > { %660 = vst.msk [vmem:[#allocation2 + $0x18] sm:$0xff] %vm286_vm0, %v643_v13  ;;  %v1387_v18 = vadd.f32 %v1386_v15, %v1385_v11  ;;  %v700_v19 = vadd.f32 %v1789_v63, %v677_v16  ;;  %672 = vst.msk [vmem:[#allocation2 + $0x78] sm:$0xff] %vm286_vm0, %v655_v17  ;;  %v688_v11 = vld [vmem:[#allocation2 + $0x60] sm:$0xff]  ;;  %v689_v15 = vld [vmem:[#allocation2 + $0x68] sm:$0xff] }
 0x101   : > { %v1388_v20 = vpop.f32.mrf.mxu0  ;;  %v1854_v17 = vadd.f32 %v1789_v63, %v689_v15 }
 0x102   : > { %v644_v21 = vadd.f32 %v1387_v18, %v307_v14  ;;  %1112 = vrot.lane.b32.xlu1 %v700_v19, %s1638_s23  ;;  %1444 = vmatmul.mubr.msk.f32.vlgmr.msra.gmra.mxu1 %vm286_vm0, %v700_v19  ;;  %v1847_v14 = vadd.f32 %v1789_v63, %v688_v11 }
 0x103   : > { %v1389_v23 = vpop.f32.mrf.mxu0  ;;  %v678_v24 = vld [vmem:[#allocation2 + $0x10] sm:$0xff] }
 0x104   : > { %661 = vst.msk [vmem:[#allocation2 + $0x20] sm:$0xff] %vm286_vm0, %v644_v21  ;;  %v1390_v25 = vadd.f32 %v1389_v23, %v1388_v20  ;;  %v701_v26 = vadd.f32 %v1789_v63, %v678_v24  ;;  %v690_v16 = vld [vmem:[#allocation2 + $0x70] sm:$0xff]  ;;  %v1337_v21 = vld [vmem:[%s2157_s4] ss:$0 sm:$0xff] }
 0x105   : > { %v1391_v27 = vpop.f32.mrf.mxu0  ;;  %v1857_v18 = vadd.f32 %v1789_v63, %v690_v16 }
 0x106   : > { %v645_v28 = vadd.f32 %v1390_v25, %v308_v22  ;;  %1114 = vrot.lane.b32.xlu1 %v701_v26, %s1638_s23  ;;  %1446 = vmatprep.mubr.msk.f32.mxu1 %vm286_vm0, %v701_v26 }
 0x107   : > { %v1392_v30 = vpop.f32.mrf.mxu0  ;;  %v679_v31 = vld [vmem:[#allocation2 + $0x18] sm:$0xff] }
 0x108   : > { %662 = vst.msk [vmem:[#allocation2 + $0x28] sm:$0xff] %vm286_vm0, %v645_v28  ;;  %v1393_v32 = vadd.f32 %v1392_v30, %v1391_v27  ;;  %v702_v33 = vadd.f32 %v1789_v63, %v679_v31  ;;  %v691_v19 = vld [vmem:[#allocation2 + $0x78] sm:$0xff] }
 0x109   : > { %v1394_v34 = vpop.f32.mrf.mxu0  ;;  %v1864_v20 = vadd.f32 %v1789_v63, %v691_v19 }
 0x10a   : > { %v646_v35 = vadd.f32 %v1393_v32, %v309_v29  ;;  %1116 = vrot.lane.b32.xlu1 %v702_v33, %s1638_s23  ;;  %1447 = vmatmul.mubr.msk.f32.gmra.mxu1 %vm286_vm0, %v702_v33 }
 0x10b   : > { %v1395_v37 = vpop.f32.mrf.mxu0  ;;  %v680_v38 = vld [vmem:[#allocation2 + $0x20] sm:$0xff] }
 0x10c   : > { %663 = vst.msk [vmem:[#allocation2 + $0x30] sm:$0xff] %vm286_vm0, %v646_v35  ;;  %v1396_v39 = vadd.f32 %v1395_v37, %v1394_v34  ;;  %v703_v40 = vadd.f32 %v1789_v63, %v680_v38 }
 0x10d   : > { %v1397_v41 = vpop.f32.mrf.mxu0 }
 0x10e   : > { %v647_v42 = vadd.f32 %v1396_v39, %v310_v36  ;;  %1118 = vrot.lane.b32.xlu0 %v703_v40, %s1638_s23  ;;  %1449 = vmatprep.mubr.msk.f32.mxu1 %vm286_vm0, %v703_v40 }
 0x10f   : > { %v1398_v44 = vpop.f32.mrf.mxu0  ;;  %v681_v45 = vld [vmem:[#allocation2 + $0x28] sm:$0xff] }
 0x110   : > { %664 = vst.msk [vmem:[#allocation2 + $0x38] sm:$0xff] %vm286_vm0, %v647_v42  ;;  %v1399_v46 = vadd.f32 %v1398_v44, %v1397_v41  ;;  %v704_v47 = vadd.f32 %v1789_v63, %v681_v45 }
 0x111   : > { %v1400_v48 = vpop.f32.mrf.mxu0 }
 0x112   : > { %v648_v49 = vadd.f32 %v1399_v46, %v311_v43  ;;  %1120 = vrot.lane.b32.xlu1 %v704_v47, %s1638_s23  ;;  %1450 = vmatmul.mubr.msk.f32.gmra.mxu1 %vm286_vm0, %v704_v47 }
 0x113   : > { %v1401_v51 = vpop.f32.mrf.mxu0  ;;  %v682_v52 = vld [vmem:[#allocation2 + $0x30] sm:$0xff] }
 0x114   : > { %665 = vst.msk [vmem:[#allocation2 + $0x40] sm:$0xff] %vm286_vm0, %v648_v49  ;;  %v1402_v53 = vadd.f32 %v1401_v51, %v1400_v48  ;;  %v705_v54 = vadd.f32 %v1789_v63, %v682_v52 }
 0x115   : > { %v1403_v55 = vpop.f32.mrf.mxu0 }
 0x116   : > { %v649_v56 = vadd.f32 %v1402_v53, %v312_v50  ;;  %1122 = vrot.lane.b32.xlu0 %v705_v54, %s1638_s23  ;;  %1452 = vmatprep.mubr.msk.f32.mxu1 %vm286_vm0, %v705_v54 }
 0x117   : > { %v1404_v58 = vpop.f32.mrf.mxu0  ;;  %v683_v59 = vld [vmem:[#allocation2 + $0x38] sm:$0xff] }
 0x118   : > { %666 = vst.msk [vmem:[#allocation2 + $0x48] sm:$0xff] %vm286_vm0, %v649_v56  ;;  %v1405_v60 = vadd.f32 %v1404_v58, %v1403_v55  ;;  %v706_v61 = vadd.f32 %v1789_v63, %v683_v59 }
 0x119   : > { %v1406_v62 = vpop.f32.mrf.mxu0 }
 0x11a   : > { %v650_v0 = vadd.f32 %v1405_v60, %v313_v57  ;;  %1124 = vrot.lane.b32.xlu1 %v706_v61, %s1638_s23  ;;  %1453 = vmatmul.mubr.msk.f32.gmra.mxu1 %vm286_vm0, %v706_v61 }
 0x11b   : > { %v1407_v2 = vpop.f32.mrf.mxu0  ;;  %v684_v3 = vld [vmem:[#allocation2 + $0x40] sm:$0xff] }
 0x11c   : > { %667 = vst.msk [vmem:[#allocation2 + $0x50] sm:$0xff] %vm286_vm0, %v650_v0  ;;  %v1408_v4 = vadd.f32 %v1407_v2, %v1406_v62  ;;  %v1828_v5 = vadd.f32 %v1789_v63, %v684_v3 }
 0x11e   : > { %v651_v6 = vadd.f32 %v1408_v4, %v314_v1  ;;  %1455 = vmatprep.mubr.msk.f32.mxu1 %vm286_vm0, %v1828_v5 }
 0x11f   : > { %v685_v7 = vld [vmem:[#allocation2 + $0x48] sm:$0xff] }
 0x120   : > { %668 = vst.msk [vmem:[#allocation2 + $0x58] sm:$0xff] %vm286_vm0, %v651_v6  ;;  %v1834_v8 = vadd.f32 %v1789_v63, %v685_v7 }
 0x122   : > { %1456 = vmatmul.mubr.msk.f32.gmra.mxu1 %vm286_vm0, %v1834_v8 }
 0x123   : > { %v686_v9 = vld [vmem:[#allocation2 + $0x50] sm:$0xff] }
 0x124   : > { %v1839_v10 = vadd.f32 %v1789_v63, %v686_v9 }
 0x126   : > { %1458 = vmatprep.mubr.msk.f32.mxu1 %vm286_vm0, %v1839_v10 }
 0x127   : > { %v687_v12 = vld [vmem:[#allocation2 + $0x58] sm:$0xff] }
 0x128   : > { %v1844_v13 = vadd.f32 %v1789_v63, %v687_v12 }
 0x12a   : > { %1459 = vmatmul.mubr.msk.f32.gmra.mxu1 %vm286_vm0, %v1844_v13 }
 0x12b   : > { %1461 = vmatprep.mubr.msk.f32.mxu1 %vm286_vm0, %v1847_v14 }
 0x12e   : > { %1462 = vmatmul.mubr.msk.f32.gmra.mxu1 %vm286_vm0, %v1854_v17 }
 0x12f   : > { %1464 = vmatprep.mubr.msk.f32.mxu1 %vm286_vm0, %v1857_v18 }
 0x132   : > { %1465 = vmatmul.mubr.msk.f32.gmra.mxu1 %vm286_vm0, %v1864_v20 }
 0x170   : > { %v1949_v9 = vpop.permute.xlu0 %1110 }
 0x174   : > { %v1947_v7 = vpop.permute.xlu1 %1112 }
 0x180   : > { %v1953_v11 = vpop.permute.xlu0 %1118 }
 0x1c2   : > { %v1445_v22 = vpop.f32.mrf.mxu1 }
 0x1c3   : > { %v1871_v23 = vadd.f32 %v1445_v22, %v1337_v21 }
 0x1c4   : > { %v838_v24 = vpop.f32.mrf.mxu1 }
 0x1c5   : > { %v1873_v25 = vadd.f32 %v1337_v21, %v838_v24  ;;  %v921_v26 = vsel %vm917_vm1, %v1871_v23, -inf }
 0x1c6   : > { %922 = vmax.xlane.f32.xlu0 %v921_v26 }
 0x1c7   : > { %v918_v63 = vsel %vm917_vm1, %v1873_v25, -inf }
 0x1ca   : > { %v1448_v27 = vpop.f32.mrf.mxu1  ;;  %919 = vmax.xlane.f32.xlu0 %v918_v63 }
 0x1cb   : > { %v1879_v28 = vadd.f32 %v1448_v27, %v1337_v21 }
 0x1cc   : > { %v848_v29 = vpop.f32.mrf.mxu1 }
 0x1cd   : > { %v1881_v30 = vadd.f32 %v1337_v21, %v848_v29  ;;  %v927_v31 = vsel %vm917_vm1, %v1879_v28, -inf }
 0x1ce   : > { %928 = vmax.xlane.f32.xlu1 %v927_v31 }
 0x1cf   : > { %v924_v32 = vsel %vm917_vm1, %v1881_v30, -inf }
 0x1d2   : > { %v1451_v33 = vpop.f32.mrf.mxu1  ;;  %925 = vmax.xlane.f32.xlu1 %v924_v32 }
 0x1d3   : > { %v1887_v34 = vadd.f32 %v1451_v33, %v1337_v21 }
 0x1d4   : > { %v858_v35 = vpop.f32.mrf.mxu1 }
 0x1d5   : > { %v1889_v36 = vadd.f32 %v1337_v21, %v858_v35  ;;  %v933_v37 = vsel %vm917_vm1, %v1887_v34, -inf }
 0x1d6   : > { %934 = vmax.xlane.f32.xlu1 %v933_v37 }
 0x1d7   : > { %v930_v38 = vsel %vm917_vm1, %v1889_v36, -inf }
 0x1d8   : > { %931 = vmax.xlane.f32.xlu0 %v930_v38 }
 0x1da   : > { %v1454_v39 = vpop.f32.mrf.mxu1 }
 0x1db   : > { %v1895_v40 = vadd.f32 %v1454_v39, %v1337_v21 }
 0x1dc   : > { %v868_v41 = vpop.f32.mrf.mxu1 }
 0x1dd   : > { %v1897_v42 = vadd.f32 %v1337_v21, %v868_v41  ;;  %v939_v43 = vsel %vm917_vm1, %v1895_v40, -inf }
 0x1de   : > { %940 = vmax.xlane.f32.xlu1 %v939_v43 }
 0x1df   : > { %v936_v44 = vsel %vm917_vm1, %v1897_v42, -inf }
 0x1e0   : > { %937 = vmax.xlane.f32.xlu0 %v936_v44 }
 0x1e2   : > { %v1457_v45 = vpop.f32.mrf.mxu1 }
 0x1e3   : > { %v1903_v46 = vadd.f32 %v1457_v45, %v1337_v21 }
 0x1e4   : > { %v878_v47 = vpop.f32.mrf.mxu1 }
 0x1e5   : > { %v1905_v48 = vadd.f32 %v1337_v21, %v878_v47  ;;  %v945_v49 = vsel %vm917_vm1, %v1903_v46, -inf }
 0x1e6   : > { %946 = vmax.xlane.f32.xlu1 %v945_v49 }
 0x1e7   : > { %v942_v50 = vsel %vm917_vm1, %v1905_v48, -inf }
 0x1e8   : > { %943 = vmax.xlane.f32.xlu0 %v942_v50 }
 0x1ea   : > { %v1460_v51 = vpop.f32.mrf.mxu1 }
 0x1eb   : > { %v1911_v52 = vadd.f32 %v1460_v51, %v1337_v21 }
 0x1ec   : > { %v888_v53 = vpop.f32.mrf.mxu1 }
 0x1ed   : > { %v1913_v54 = vadd.f32 %v1337_v21, %v888_v53  ;;  %v951_v55 = vsel %vm917_vm1, %v1911_v52, -inf }
 0x1ee   : > { %v1463_v56 = vpop.f32.mrf.mxu1  ;;  %952 = vmax.xlane.f32.xlu1 %v951_v55 }
 0x1ef   : > { %v1917_v57 = vadd.f32 %v1463_v56, %v1337_v21  ;;  %v948_v58 = vsel %vm917_vm1, %v1913_v54, -inf }
 0x1f0   : > { %v898_v59 = vpop.f32.mrf.mxu1  ;;  %949 = vmax.xlane.f32.xlu0 %v948_v58 }
 0x1f1   : > { %v1921_v60 = vadd.f32 %v1337_v21, %v898_v59  ;;  %v957_v61 = vsel %vm917_vm1, %v1917_v57, -inf }
 0x1f2   : > { %v1466_v62 = vpop.f32.mrf.mxu1  ;;  %958 = vmax.xlane.f32.xlu1 %v957_v61 }
 0x1f3   : > { %v1925_v0 = vadd.f32 %v1466_v62, %v1337_v21  ;;  %v954_v1 = vsel %vm917_vm1, %v1921_v60, -inf }
 0x1f4   : > { %v908_v2 = vpop.f32.mrf.mxu1  ;;  %955 = vmax.xlane.f32.xlu0 %v954_v1 }
 0x1f5   : > { %v1929_v3 = vadd.f32 %v1337_v21, %v908_v2  ;;  %v963_v4 = vsel %vm917_vm1, %v1925_v0, -inf }
 0x1f6   : > { %964 = vmax.xlane.f32.xlu1 %v963_v4 }
 0x1f7   : > { %v960_v6 = vsel %vm917_vm1, %v1929_v3, -inf }
 0x1f8   : > { %961 = vmax.xlane.f32.xlu0 %v960_v6 }
 0x207   : > { %1128 = vrot.lane.b32.xlu1 %v1834_v8, %s1638_s23  ;;  %v1951_v8 = vpop.permute.xlu1 %1114 }
 0x20b   : > { %1132 = vrot.lane.b32.xlu1 %v1844_v13, %s1638_s23  ;;  %v1955_v12 = vpop.permute.xlu1 %1116 }
 0x20e   : > { %1126 = vrot.lane.b32.xlu0 %v1828_v5, %s1638_s23  ;;  %v1957_v5 = vpop.permute.xlu0 %1122 }
 0x20f   : > { %1136 = vrot.lane.b32.xlu1 %v1854_v17, %s1638_s23  ;;  %v1959_v13 = vpop.permute.xlu1 %1120 }
 0x212   : > { %1130 = vrot.lane.b32.xlu0 %v1839_v10, %s1638_s23 }
 0x213   : > { %v1965_v16 = vpop.permute.xlu1 %1124 }
 0x216   : > { %1134 = vrot.lane.b32.xlu0 %v1847_v14, %s1638_s23 }
 0x24f   : > { %v923_v15 = vpop.xlane.xlu0 %922 }
 0x250   : > { %v1962_v10 = vsub.f32 %v1871_v23, %v923_v15 }
 0x252   : > { %v984_v14 = vmul.f32 1.442695, %v1962_v10 }
 0x253   : > { %v920_v17 = vpop.xlane.xlu0 %919 }
 0x254   : > { %1549 = vpow2.f32 %v984_v14  ;;  %v1968_v19 = vsub.f32 %v1873_v25, %v920_v17 }
 0x256   : > { %v982_v21 = vmul.f32 1.442695, %v1968_v19 }
 0x257   : > { %v929_v22 = vpop.xlane.xlu1 %928 }
 0x258   : > { %1551 = vpow2.f32 %v982_v21  ;;  %v1972_v24 = vsub.f32 %v1879_v28, %v929_v22 }
 0x25a   : > { %v988_v26 = vmul.f32 1.442695, %v1972_v24 }
 0x25b   : > { %v926_v23 = vpop.xlane.xlu1 %925 }
 0x25c   : > { %1553 = vpow2.f32 %v988_v26  ;;  %v1976_v63 = vsub.f32 %v1881_v30, %v926_v23 }
 0x25e   : > { %v986_v27 = vmul.f32 1.442695, %v1976_v63 }
 0x25f   : > { %v935_v29 = vpop.xlane.xlu1 %934 }
 0x260   : > { %1555 = vpow2.f32 %v986_v27  ;;  %v1980_v25 = vsub.f32 %v1887_v34, %v935_v29 }
 0x261   : > { %v1550_v31 = vpop.eup %1549  ;;  %v932_v32 = vpop.xlane.xlu0 %931 }
 0x262   : > { %v992_v33 = vmul.f32 1.442695, %v1980_v25  ;;  %v1984_v28 = vsub.f32 %v1889_v36, %v932_v32  ;;  %v1017_v35 = vsel %vm917_vm1, %v1550_v31, 0.0 }
 0x263   : > { %1018 = vadd.xlane.f32.xlu1 %v1017_v35 }
 0x264   : > { %1557 = vpow2.f32 %v992_v33  ;;  %v990_v30 = vmul.f32 1.442695, %v1984_v28 }
 0x265   : > { %v1552_v37 = vpop.eup %1551 }
 0x266   : > { %1559 = vpow2.f32 %v990_v30  ;;  %v1014_v38 = vsel %vm917_vm1, %v1552_v37, 0.0 }
 0x267   : > { %v941_v39 = vpop.xlane.xlu1 %940  ;;  %1015 = vadd.xlane.f32.xlu0 %v1014_v38 }
 0x268   : > { %v1990_v34 = vsub.f32 %v1895_v40, %v941_v39 }
 0x269   : > { %v1554_v41 = vpop.eup %1553  ;;  %v938_v43 = vpop.xlane.xlu0 %937 }
 0x26a   : > { %v996_v36 = vmul.f32 1.442695, %v1990_v34  ;;  %v1994_v44 = vsub.f32 %v1897_v42, %v938_v43  ;;  %v1023_v45 = vsel %vm917_vm1, %v1554_v41, 0.0 }
 0x26b   : > { %1024 = vadd.xlane.f32.xlu1 %v1023_v45 }
 0x26c   : > { %1561 = vpow2.f32 %v996_v36  ;;  %v994_v47 = vmul.f32 1.442695, %v1994_v44 }
 0x26d   : > { %v1556_v49 = vpop.eup %1555 }
 0x26e   : > { %1563 = vpow2.f32 %v994_v47  ;;  %v1020_v50 = vsel %vm917_vm1, %v1556_v49, 0.0 }
 0x26f   : > { %v947_v51 = vpop.xlane.xlu1 %946  ;;  %1021 = vadd.xlane.f32.xlu0 %v1020_v50 }
 0x270   : > { %v2000_v40 = vsub.f32 %v1903_v46, %v947_v51 }
 0x271   : > { %v1558_v53 = vpop.eup %1557  ;;  %v944_v55 = vpop.xlane.xlu0 %943 }
 0x272   : > { %v1000_v42 = vmul.f32 1.442695, %v2000_v40  ;;  %v2004_v56 = vsub.f32 %v1905_v48, %v944_v55  ;;  %v1029_v58 = vsel %vm917_vm1, %v1558_v53, 0.0 }
 0x273   : > { %v1560_v59 = vpop.eup %1559  ;;  %1030 = vadd.xlane.f32.xlu1 %v1029_v58 }
 0x274   : > { %1565 = vpow2.f32 %v1000_v42  ;;  %v998_v61 = vmul.f32 1.442695, %v2004_v56  ;;  %v1026_v62 = vsel %vm917_vm1, %v1560_v59, 0.0 }
 0x275   : > { %1027 = vadd.xlane.f32.xlu0 %v1026_v62 }
 0x276   : > { %1567 = vpow2.f32 %v998_v61 }
 0x277   : > { %v953_v46 = vpop.xlane.xlu1 %952 }
 0x278   : > { %v2010_v1 = vsub.f32 %v1911_v52, %v953_v46 }
 0x279   : > { %v1562_v2 = vpop.eup %1561  ;;  %v950_v4 = vpop.xlane.xlu0 %949 }
 0x27a   : > { %v1004_v48 = vmul.f32 1.442695, %v2010_v1  ;;  %v2014_v6 = vsub.f32 %v1913_v54, %v950_v4  ;;  %v1035_v15 = vsel %vm917_vm1, %v1562_v2, 0.0 }
 0x27b   : > { %v1564_v14 = vpop.eup %1563  ;;  %1036 = vadd.xlane.f32.xlu1 %v1035_v15  ;;  %v959_v17 = vpop.xlane.xlu1 %958 }
 0x27c   : > { %1569 = vpow2.f32 %v1004_v48  ;;  %v1002_v21 = vmul.f32 1.442695, %v2014_v6  ;;  %v2019_v22 = vsub.f32 %v1917_v57, %v959_v17  ;;  %v1032_v52 = vsel %vm917_vm1, %v1564_v14, 0.0 }
 0x27d   : > { %1033 = vadd.xlane.f32.xlu0 %v1032_v52  ;;  %v956_v26 = vpop.xlane.xlu0 %955 }
 0x27e   : > { %1571 = vpow2.f32 %v1002_v21  ;;  %v1008_v23 = vmul.f32 1.442695, %v2019_v22  ;;  %v2024_v54 = vsub.f32 %v1921_v60, %v956_v26 }
 0x27f   : > { %v965_v27 = vpop.xlane.xlu1 %964 }
 0x280   : > { %1573 = vpow2.f32 %v1008_v23  ;;  %v1006_v29 = vmul.f32 1.442695, %v2024_v54  ;;  %v2028_v31 = vsub.f32 %v1925_v0, %v965_v27 }
 0x281   : > { %v1566_v32 = vpop.eup %1565  ;;  %v962_v57 = vpop.xlane.xlu0 %961 }
 0x282   : > { %1575 = vpow2.f32 %v1006_v29  ;;  %v1012_v33 = vmul.f32 1.442695, %v2028_v31  ;;  %v2032_v35 = vsub.f32 %v1929_v3, %v962_v57  ;;  %v1041_v30 = vsel %vm917_vm1, %v1566_v32, 0.0 }
 0x283   : > { %v1568_v37 = vpop.eup %1567  ;;  %1042 = vadd.xlane.f32.xlu1 %v1041_v30  ;;  %v2047_v55 = vpop.permute.xlu1 %1128 }
 0x284   : > { %1577 = vpow2.f32 %v1012_v33  ;;  %v1010_v60 = vmul.f32 1.442695, %v2032_v35  ;;  %v1038_v38 = vsel %vm917_vm1, %v1568_v37, 0.0 }
 0x285   : > { %1039 = vadd.xlane.f32.xlu0 %v1038_v38  ;;  %v2049_v42 = vpop.permute.xlu0 %1126 }
 0x286   : > { %1579 = vpow2.f32 %v1010_v60 }
 0x287   : > { %v2051_v58 = vpop.permute.xlu1 %1132 }
 0x289   : > { %v1570_v0 = vpop.eup %1569  ;;  %v2053_v59 = vpop.permute.xlu0 %1130 }
 0x28a   : > { %v1047_v39 = vsel %vm917_vm1, %v1570_v0, 0.0 }
 0x28b   : > { %v1572_v41 = vpop.eup %1571  ;;  %1048 = vadd.xlane.f32.xlu1 %v1047_v39  ;;  %v2055_v61 = vpop.permute.xlu1 %1136 }
 0x28c   : > { %v1044_v43 = vsel %vm917_vm1, %v1572_v41, 0.0 }
 0x28d   : > { %v1574_v3 = vpop.eup %1573  ;;  %1045 = vadd.xlane.f32.xlu0 %v1044_v43  ;;  %v2057_v62 = vpop.permute.xlu0 %1134 }
 0x28e   : > { %v1053_v36 = vsel %vm917_vm1, %v1574_v3, 0.0 }
 0x28f   : > { %v1576_v45 = vpop.eup %1575  ;;  %1054 = vadd.xlane.f32.xlu1 %v1053_v36 }
 0x290   : > { %v1050_v47 = vsel %vm917_vm1, %v1576_v45, 0.0 }
 0x291   : > { %v1578_v49 = vpop.eup %1577  ;;  %1051 = vadd.xlane.f32.xlu0 %v1050_v47 }
 0x292   : > { %v1059_v50 = vsel %vm917_vm1, %v1578_v49, 0.0 }
 0x293   : > { %v1580_v51 = vpop.eup %1579  ;;  %1060 = vadd.xlane.f32.xlu1 %v1059_v50 }
 0x294   : > { %v1056_v53 = vsel %vm917_vm1, %v1580_v51, 0.0 }
 0x295   : > { %1057 = vadd.xlane.f32.xlu0 %v1056_v53 }
 0x2a4   : > { %1140 = vrot.lane.b32.xlu1 %v1864_v20, %s1638_s23 }
 0x2ab   : > { %1138 = vrot.lane.b32.xlu0 %v1857_v18, %s1638_s23 }
 0x2ec   : > { %v1019_v46 = vpop.xlane.xlu1 %1018 }
 0x2ed   : > { %1581 = vlog2.f32 %v1019_v46 }
 0x2f0   : > { %v1016_v2 = vpop.xlane.xlu0 %1015 }
 0x2f1   : > { %1583 = vlog2.f32 %v1016_v2 }
 0x2f4   : > { %v1025_v20 = vpop.xlane.xlu1 %1024 }
 0x2f5   : > { %1585 = vlog2.f32 %v1025_v20 }
 0x2f8   : > { %v1022_v18 = vpop.xlane.xlu0 %1021 }
 0x2f9   : > { %1587 = vlog2.f32 %v1022_v18 }
 0x2fa   : > { %v1582_v4 = vpop.eup %1581 }
 0x2fb   : > { %v1065_v48 = vmul.f32 0.6931472, %v1582_v4 }
 0x2fc   : > { %v1031_v15 = vpop.xlane.xlu1 %1030 }
 0x2fd   : > { %v1095_v14 = vsub.f32 %v1962_v10, %v1065_v48  ;;  %1589 = vlog2.f32 %v1031_v15 }
 0x2fe   : > { %v1584_v17 = vpop.eup %1583  ;;  %v1028_v21 = vpop.xlane.xlu0 %1027 }
 0x2ff   : > { %v1159_v52 = vsel %vm917_vm1, %v1095_v14, %v1947_v7  ;;  %v1063_v26 = vmul.f32 0.6931472, %v1584_v17  ;;  %1591 = vlog2.f32 %v1028_v21 }
 0x300   : > { %v1176_v23 = vsel %vm1174_vm2, %v1159_v52, 0.0 }
 0x301   : > { %1192 = vst [vmem:[%s2065_s29 + $0x8] sm:$0xff] %v1176_v23  ;;  %v1094_v10 = vsub.f32 %v1968_v19, %v1063_v26 }
 0x302   : > { %v1586_v27 = vpop.eup %1585 }
 0x303   : > { %v1158_v29 = vsel %vm917_vm1, %v1094_v10, %v1949_v9  ;;  %v1069_v32 = vmul.f32 0.6931472, %v1586_v27 }
 0x304   : > { %v1175_v57 = vsel %vm1174_vm2, %v1158_v29, 0.0  ;;  %v1037_v33 = vpop.xlane.xlu1 %1036 }
 0x305   : > { %1191 = vst [vmem:[%s2065_s29] sm:$0xff] %v1175_v57  ;;  %v1097_v30 = vsub.f32 %v1972_v24, %v1069_v32  ;;  %1593 = vlog2.f32 %v1037_v33 }
 0x306   : > { %v1588_v7 = vpop.eup %1587  ;;  %v1034_v37 = vpop.xlane.xlu0 %1033 }
 0x307   : > { %v1161_v60 = vsel %vm917_vm1, %v1097_v30, %v1955_v12  ;;  %v1067_v38 = vmul.f32 0.6931472, %v1588_v7  ;;  %1595 = vlog2.f32 %v1034_v37 }
 0x308   : > { %v1178_v19 = vsel %vm1174_vm2, %v1161_v60, 0.0 }
 0x309   : > { %1194 = vst [vmem:[%s2065_s29 + $0x18] sm:$0xff] %v1178_v19  ;;  %v1096_v9 = vsub.f32 %v1976_v63, %v1067_v38 }
 0x30a   : > { %v1590_v0 = vpop.eup %1589 }
 0x30b   : > { %v1160_v39 = vsel %vm917_vm1, %v1096_v9, %v1951_v8  ;;  %v1073_v24 = vmul.f32 0.6931472, %v1590_v0 }
 0x30c   : > { %v1592_v41 = vpop.eup %1591  ;;  %v1177_v43 = vsel %vm1174_vm2, %v1160_v39, 0.0  ;;  %v1043_v3 = vpop.xlane.xlu1 %1042 }
 0x30d   : > { %1193 = vst [vmem:[%s2065_s29 + $0x10] sm:$0xff] %v1177_v43  ;;  %v1099_v12 = vsub.f32 %v1980_v25, %v1073_v24  ;;  %v1071_v36 = vmul.f32 0.6931472, %v1592_v41  ;;  %1597 = vlog2.f32 %v1043_v3 }
 0x30e   : > { %v1040_v45 = vpop.xlane.xlu0 %1039 }
 0x30f   : > { %v1163_v63 = vsel %vm917_vm1, %v1099_v12, %v1959_v13  ;;  %v1098_v47 = vsub.f32 %v1984_v28, %v1071_v36  ;;  %1599 = vlog2.f32 %v1040_v45 }
 0x310   : > { %v1180_v8 = vsel %vm1174_vm2, %v1163_v63, 0.0 }
 0x311   : > { %1196 = vst [vmem:[%s2065_s29 + $0x28] sm:$0xff] %v1180_v8  ;;  %v1162_v49 = vsel %vm917_vm1, %v1098_v47, %v1953_v11 }
 0x312   : > { %v1594_v50 = vpop.eup %1593  ;;  %v1179_v51 = vsel %vm1174_vm2, %v1162_v49, 0.0 }
 0x313   : > { %1195 = vst [vmem:[%s2065_s29 + $0x20] sm:$0xff] %v1179_v51  ;;  %v1077_v25 = vmul.f32 0.6931472, %v1594_v50 }
 0x314   : > { %v1596_v53 = vpop.eup %1595  ;;  %v1049_v46 = vpop.xlane.xlu1 %1048 }
 0x315   : > { %v1101_v13 = vsub.f32 %v1990_v34, %v1077_v25  ;;  %v1075_v2 = vmul.f32 0.6931472, %v1596_v53  ;;  %1601 = vlog2.f32 %v1049_v46 }
 0x316   : > { %v1046_v28 = vpop.xlane.xlu0 %1045 }
 0x317   : > { %v1165_v20 = vsel %vm917_vm1, %v1101_v13, %v1965_v16  ;;  %v1100_v18 = vsub.f32 %v1994_v44, %v1075_v2  ;;  %1603 = vlog2.f32 %v1046_v28 }
 0x318   : > { %v1182_v11 = vsel %vm1174_vm2, %v1165_v20, 0.0  ;;  %v1055_v4 = vpop.xlane.xlu1 %1054 }
 0x319   : > { %1198 = vst [vmem:[%s2065_s29 + $0x38] sm:$0xff] %v1182_v11  ;;  %v1164_v48 = vsel %vm917_vm1, %v1100_v18, %v1957_v5  ;;  %1605 = vlog2.f32 %v1055_v4 }
 0x31a   : > { %v1598_v15 = vpop.eup %1597  ;;  %v1181_v34 = vsel %vm1174_vm2, %v1164_v48, 0.0  ;;  %v1052_v14 = vpop.xlane.xlu0 %1051 }
 0x31b   : > { %1197 = vst [vmem:[%s2065_s29 + $0x30] sm:$0xff] %v1181_v34  ;;  %v1081_v17 = vmul.f32 0.6931472, %v1598_v15  ;;  %1607 = vlog2.f32 %v1052_v14 }
 0x31c   : > { %v1600_v16 = vpop.eup %1599  ;;  %v1061_v44 = vpop.xlane.xlu1 %1060 }
 0x31d   : > { %v1103_v21 = vsub.f32 %v2000_v40, %v1081_v17  ;;  %v1079_v52 = vmul.f32 0.6931472, %v1600_v16  ;;  %1609 = vlog2.f32 %v1061_v44 }
 0x31e   : > { %v1058_v26 = vpop.xlane.xlu0 %1057 }
 0x31f   : > { %v1167_v5 = vsel %vm917_vm1, %v1103_v21, %v2047_v55  ;;  %v1102_v23 = vsub.f32 %v2004_v56, %v1079_v52  ;;  %1611 = vlog2.f32 %v1058_v26 }
 0x320   : > { %v1184_v10 = vsel %vm1174_vm2, %v1167_v5, 0.0  ;;  %v1141_v12 = vpop.permute.xlu1 %1140 }
 0x321   : > { %1200 = vst [vmem:[%s2065_s29 + $0x48] sm:$0xff] %v1184_v10  ;;  %v1166_v27 = vsel %vm917_vm1, %v1102_v23, %v2049_v42 }
 0x322   : > { %v1602_v29 = vpop.eup %1601  ;;  %v1183_v32 = vsel %vm1174_vm2, %v1166_v27, 0.0  ;;  %v1139_v45 = vpop.permute.xlu0 %1138 }
 0x323   : > { %1199 = vst [vmem:[%s2065_s29 + $0x40] sm:$0xff] %v1183_v32  ;;  %v1085_v40 = vmul.f32 0.6931472, %v1602_v29 }
 0x324   : > { %v1604_v57 = vpop.eup %1603 }
 0x325   : > { %v1105_v33 = vsub.f32 %v2010_v1, %v1085_v40  ;;  %v1083_v55 = vmul.f32 0.6931472, %v1604_v57 }
 0x326   : > { %v1606_v30 = vpop.eup %1605 }
 0x327   : > { %v1169_v56 = vsel %vm917_vm1, %v1105_v33, %v2051_v58  ;;  %v1104_v7 = vsub.f32 %v2014_v6, %v1083_v55  ;;  %v1089_v37 = vmul.f32 0.6931472, %v1606_v30 }
 0x328   : > { %v1608_v60 = vpop.eup %1607  ;;  %v1186_v42 = vsel %vm1174_vm2, %v1169_v56, 0.0 }
 0x329   : > { %1202 = vst [vmem:[%s2065_s29 + $0x58] sm:$0xff] %v1186_v42  ;;  %v1168_v38 = vsel %vm917_vm1, %v1104_v7, %v2053_v59  ;;  %v1107_v19 = vsub.f32 %v2019_v22, %v1089_v37  ;;  %v1087_v1 = vmul.f32 0.6931472, %v1608_v60 }
 0x32a   : > { %v1610_v9 = vpop.eup %1609  ;;  %v1185_v0 = vsel %vm1174_vm2, %v1168_v38, 0.0 }
 0x32b   : > { %1201 = vst [vmem:[%s2065_s29 + $0x50] sm:$0xff] %v1185_v0  ;;  %v1171_v6 = vsel %vm917_vm1, %v1107_v19, %v2055_v61  ;;  %v1106_v58 = vsub.f32 %v2024_v54, %v1087_v1  ;;  %v1093_v39 = vmul.f32 0.6931472, %v1610_v9 }
 0x32c   : > { %v1612_v24 = vpop.eup %1611  ;;  %v1188_v41 = vsel %vm1174_vm2, %v1171_v6, 0.0 }
 0x32d   : > { %1204 = vst [vmem:[%s2065_s29 + $0x68] sm:$0xff] %v1188_v41  ;;  %v1170_v22 = vsel %vm917_vm1, %v1106_v58, %v2057_v62  ;;  %v1109_v59 = vsub.f32 %v2028_v31, %v1093_v39  ;;  %v1091_v43 = vmul.f32 0.6931472, %v1612_v24 }
 0x32e   : > { %v1187_v3 = vsel %vm1174_vm2, %v1170_v22, 0.0 }
 0x32f   : > { %1203 = vst [vmem:[%s2065_s29 + $0x60] sm:$0xff] %v1187_v3  ;;  %v1108_v61 = vsub.f32 %v2032_v35, %v1091_v43  ;;  %v1173_v54 = vsel %vm917_vm1, %v1109_v59, %v1141_v12 }
 0x330   : > { %v1190_v36 = vsel %vm1174_vm2, %v1173_v54, 0.0 }
 0x331   : > { %1206 = vst [vmem:[%s2065_s29 + $0x78] sm:$0xff] %v1190_v36  ;;  %v1172_v63 = vsel %vm917_vm1, %v1108_v61, %v1139_v45 }
 0x332   : > { %v1189_v47 = vsel %vm1174_vm2, %v1172_v63, 0.0 }
 0x333   : > { %1205 = vst [vmem:[%s2065_s29 + $0x70] sm:$0xff] %v1189_v47 }
 0x334 PF: > { %s15_s20 = sadd.s32 1, %s1635_s20   ;;  %s2159_s18 = smov %s1631_s19 }
 0x335   : > { %p12_p5 = scmp.ge.s32.totalorder %s15_s20, 4   ;;  %s2160_s19 = smov %s2162_s21 }
 0x337   :  { %14 = sbr.rel (!%p12_p5) target bundleno = 2 (0x2), region = 81 }

</bundles_post_ra>
